<compile_context>
chip_gen: v7x
topology: tpu7x:2x2x1
jax: 0.10.0
libtpu: 0.0.40
codegen_flags: <defaults>
</compile_context>

<pallas_src>
import functools

import jax
import jax.numpy as jnp
from jax.experimental import pallas as pl
from jax.experimental.pallas import tpu as pltpu

BN_EPS = 1e-5  # PyTorch BatchNorm1d default eps


# ----------------------------------------------------------------------------------------------
# GIN conv layer kernel:  sum-aggregation + GINMLP + outer BatchNorm (+ ReLU)
# ----------------------------------------------------------------------------------------------
def _gin_layer_kernel(a_ref, h_ref, w1_ref, w2_ref, aff_ref, out_ref, *, apply_relu):
    # a_ref:   (N_dst, N_src) dense 0/1 block adjacency (dst nodes = first N_dst src nodes)
    # h_ref:   (N_src, D_in)  input node features
    # w1_ref:  (D_in, H)      GINMLP Linear(in, hid), bias=False   (stored [in, out])
    # w2_ref:  (H, H)         GINMLP Linear(hid, out), bias=False
    # aff_ref: (4, 1, H)      folded eval-mode BatchNorm affines: [s1, t1, s2, t2]
    # out_ref: (N_dst, H)
    n_dst = a_ref.shape[0]
    h = h_ref[...]
    agg = jnp.dot(a_ref[...], h, preferred_element_type=jnp.float32)   # sum over in-neighbours
    rst = h[:n_dst, :] + agg                  # (1 + eps) * h_dst + agg, eps = 0 (learn_eps=False)
    z = jnp.dot(rst, w1_ref[...], preferred_element_type=jnp.float32)
    z = jnp.maximum(z * aff_ref[0] + aff_ref[1], 0.0)                  # GINMLP BatchNorm + ReLU
    z = jnp.dot(z, w2_ref[...], preferred_element_type=jnp.float32)
    z = z * aff_ref[2] + aff_ref[3]                                    # outer BatchNorm
    if apply_relu:
        z = jnp.maximum(z, 0.0)
    out_ref[...] = z


def _gin_layer(adj, h, w1, w2, aff, *, apply_relu):
    n_dst = adj.shape[0]
    hid = w2.shape[1]
    kernel = functools.partial(_gin_layer_kernel, apply_relu=apply_relu)
    # Small whole-array blocks (node counts are sampled-block sized) -> no grid needed.
    return pl.pallas_call(
        kernel,
        out_shape=jax.ShapeDtypeStruct((n_dst, hid), jnp.float32),
    )(adj, h, w1, w2, aff)


def _fold_bn(bn):
    # Eval-mode BatchNorm1d folded into z * scale + shift.
    scale = bn["gamma"] / jnp.sqrt(bn["var"] + BN_EPS)
    shift = bn["beta"] - bn["mean"] * scale
    return scale, shift


# ----------------------------------------------------------------------------------------------
# Edge predictor kernel: Sequential(Linear(H,H), ReLU, Linear(H,H), ReLU, Linear(H,1))
# applied to h[src] * h[dst].  Activations are (H, tile_e): the edge axis lives on lanes,
# so every store is lane-dense and the final projection is a VPU mul + sublane reduce.
# ----------------------------------------------------------------------------------------------
def _predictor_kernel(src_ref, dst_ref, w_ref, v_ref, bf_ref, out_ref):
    # src_ref/dst_ref: (H, TE)  transposed gathered endpoint features for this edge tile
    # w_ref:  (2, H, H)  hidden Linear weights, already transposed to (out, in)  -> z = W^T @ h
    # v_ref:  (3, H, 1)  packed H-vectors: [bias1, bias2, final weight column]
    # bf_ref: (1, 1)     final Linear(H,1) bias, scalar in SMEM
    # out_ref:(1, TE)    lane-dense row of scores
    h = src_ref[...] * dst_ref[...]                                    # elementwise edge features
    for l in range(2):                                                 # Linear(H,H) + ReLU, twice
        h = jnp.maximum(
            jnp.dot(w_ref[l], h, preferred_element_type=jnp.float32) + v_ref[l], 0.0)
    # Final Linear(H,1): VPU multiply + cross-sublane reduce -> (1, TE) lane-dense row.
    out_ref[...] = jnp.sum(h * v_ref[2], axis=0, keepdims=True) + bf_ref[0, 0]


def _predictor_scores(src_t, dst_t, params, *, tile_e):
    hid, n_edges = src_t.shape
    n_tiles = pl.cdiv(n_edges, tile_e)
    e_pad = n_tiles * tile_e
    if e_pad != n_edges:                                   # pad instead of asserting divisibility
        pad = ((0, 0), (0, e_pad - n_edges))
        src_t = jnp.pad(src_t, pad)
        dst_t = jnp.pad(dst_t, pad)

    w_t = jnp.swapaxes(params["pred_w"], 1, 2)             # (2, H_out, H_in) for W^T @ h
    v = jnp.concatenate([params["pred_b"][:, :, None],     # (2, H, 1) hidden biases
                         params["pred_wf"][None]], axis=0)  # + (1, H, 1) final weight -> (3, H, 1)
    bf = params["pred_bf"]                                 # (1, 1) scalar -> SMEM

    out = pl.pallas_call(
        _predictor_kernel,
        out_shape=jax.ShapeDtypeStruct((1, e_pad), jnp.float32),
        grid=(n_tiles,),
        in_specs=[
            pl.BlockSpec((hid, tile_e), lambda i: (0, i)),       # src features tile
            pl.BlockSpec((hid, tile_e), lambda i: (0, i)),       # dst features tile
            pl.BlockSpec((2, hid, hid), lambda i: (0, 0, 0)),    # resident weight stack
            pl.BlockSpec((3, hid, 1), lambda i: (0, 0, 0)),      # packed bias/weight vectors
            pl.BlockSpec(memory_space=pltpu.MemorySpace.SMEM),   # scalar final bias
        ],
        out_specs=pl.BlockSpec((1, tile_e), lambda i: (0, i)),   # lane-dense output row
        compiler_params=pltpu.CompilerParams(
            dimension_semantics=("parallel",),                    # edge tiles shard across TCs
            vmem_limit_bytes=48 * 1024 * 1024),                   # raised scoped VMEM limit
    )(src_t, dst_t, w_t, v, bf)
    return out[0, :n_edges][:, None]                              # (E, 1)


# ----------------------------------------------------------------------------------------------
# Full GIN forward
# ----------------------------------------------------------------------------------------------
def gin_link_pred(params, x, adjs, pos_src, pos_dst, neg_src, neg_dst, *, tile_e=256):
    h = x
    n_gin = len(params["gin"])
    for l, (adj, lp) in enumerate(zip(adjs, params["gin"])):
        s1, t1 = _fold_bn(lp["bn1"])
        s2, t2 = _fold_bn(lp["bn2"])
        aff = jnp.stack([s1, t1, s2, t2])[:, None, :]             # (4, 1, H)
        h = _gin_layer(adj, h, lp["w1"], lp["w2"], aff, apply_relu=(l != n_gin - 1))

    # Merge pos + neg edges into ONE predictor pallas_call (perf feedback).
    src = jnp.concatenate([pos_src, neg_src])
    dst = jnp.concatenate([pos_dst, neg_dst])
    h_t = h.T                                                     # tiny (N,H)->(H,N) transpose (glue)
    scores = _predictor_scores(h_t[:, src], h_t[:, dst], params, tile_e=tile_e)
    n_pos = pos_src.shape[0]
    return scores[:n_pos], scores[n_pos:]


# ----------------------------------------------------------------------------------------------
# Parameters + pure-JAX reference
# ----------------------------------------------------------------------------------------------
def init_params(key, in_size, hid_size, num_layers=3):
    n_gin = num_layers - 1
    keys = iter(jax.random.split(key, n_gin * 10 + 6))

    def uniform(shape, lo, hi):
        return jax.random.uniform(next(keys), shape, jnp.float32, lo, hi)

    def linear_w(fan_in, shape):
        b = 1.0 / float(fan_in) ** 0.5
        return uniform(shape, -b, b)

    def bn_params():  # eval-mode BatchNorm1d params (gamma/beta + running stats)
        return dict(gamma=uniform((hid_size,), 0.5, 1.5),
                    beta=uniform((hid_size,), -0.1, 0.1),
                    mean=uniform((hid_size,), -0.1, 0.1),
                    var=uniform((hid_size,), 0.5, 1.5))

    gin = []
    for l in range(n_gin):
        d_in = in_size if l == 0 else hid_size
        gin.append(dict(w1=linear_w(d_in, (d_in, hid_size)),
                        w2=linear_w(hid_size, (hid_size, hid_size)),
                        bn1=bn_params(),
                        bn2=bn_params()))

    b = 1.0 / float(hid_size) ** 0.5
    pw1, pb1 = linear_w(hid_size, (hid_size, hid_size)), uniform((hid_size,), -b, b)
    pw2, pb2 = linear_w(hid_size, (hid_size, hid_size)), uniform((hid_size,), -b, b)
    pwf, pbf = linear_w(hid_size, (hid_size, 1)), uniform((1, 1), -b, b)
    return dict(gin=gin,
                pred_w=jnp.stack([pw1, pw2]),   # (2, H, H) stored [in, out]
                pred_b=jnp.stack([pb1, pb2]),   # (2, H)
                pred_wf=pwf,                    # (H, 1)
                pred_bf=pbf)                    # (1, 1)


def reference_forward(params, x, adjs, pos_src, pos_dst, neg_src, neg_dst):
    h = x
    n_gin = len(params["gin"])
    for l, (adj, lp) in enumerate(zip(adjs, params["gin"])):
        n_dst = adj.shape[0]
        rst = h[:n_dst] + adj @ h
        z = rst @ lp["w1"]
        b1 = lp["bn1"]
        z = (z - b1["mean"]) / jnp.sqrt(b1["var"] + BN_EPS) * b1["gamma"] + b1["beta"]
        z = jnp.maximum(z, 0.0)
        z = z @ lp["w2"]
        b2 = lp["bn2"]
        z = (z - b2["mean"]) / jnp.sqrt(b2["var"] + BN_EPS) * b2["gamma"] + b2["beta"]
        if l != n_gin - 1:
            z = jnp.maximum(z, 0.0)
        h = z

    def predict(e):
        for l in range(2):
            e = jnp.maximum(e @ params["pred_w"][l] + params["pred_b"][l], 0.0)
        return e @ params["pred_wf"] + params["pred_bf"]

    return predict(h[pos_src] * h[pos_dst]), predict(h[neg_src] * h[neg_dst])


# ----------------------------------------------------------------------------------------------
if __name__ == "__main__":
    key = jax.random.PRNGKey(0)
    ks = jax.random.split(key, 8)

    IN_SIZE, HID_SIZE, NUM_LAYERS = 32, 64, 3
    N0, N1, N2 = 96, 64, 48          # sampled-block src node counts (dst nodes = prefix)
    E_POS = E_NEG = 300              # -> 600 merged edges -> 3 grid steps of 256 (>=2 for v7x)

    x = jax.random.normal(ks[0], (N0, IN_SIZE), jnp.float32)
    adj1 = jax.random.bernoulli(ks[1], 0.25, (N1, N0)).astype(jnp.float32)
    adj2 = jax.random.bernoulli(ks[2], 0.25, (N2, N1)).astype(jnp.float32)
    pos_src = jax.random.randint(ks[3], (E_POS,), 0, N2)
    pos_dst = jax.random.randint(ks[4], (E_POS,), 0, N2)
    neg_src = jax.random.randint(ks[5], (E_NEG,), 0, N2)
    neg_dst = jax.random.randint(ks[6], (E_NEG,), 0, N2)
    params = init_params(ks[7], IN_SIZE, HID_SIZE, NUM_LAYERS)

    fwd = jax.jit(gin_link_pred, static_argnames=("tile_e",))
    h_pos, h_neg = fwd(params, x, (adj1, adj2), pos_src, pos_dst, neg_src, neg_dst)
    jax.block_until_ready((h_pos, h_neg))

    ref_pos, ref_neg = reference_forward(params, x, (adj1, adj2),
                                         pos_src, pos_dst, neg_src, neg_dst)
    err = max(float(jnp.max(jnp.abs(h_pos - ref_pos) / (jnp.abs(ref_pos) + 1.0))),
              float(jnp.max(jnp.abs(h_neg - ref_neg) / (jnp.abs(ref_neg) + 1.0))))
    assert h_pos.shape == (E_POS, 1) and h_neg.shape == (E_NEG, 1)
    assert err < 1e-3, f"max relative error too large: {err}"
    print("KERNEL_OK")
</pallas_src>

<mosaic_0001>
module attributes {stable_mosaic.version = 11 : i64} {
  func.func @_gin_layer_kernel(%arg0: memref<64x96xf32, #tpu.memory_space<vmem>>, %arg1: memref<96x32xf32, #tpu.memory_space<vmem>>, %arg2: memref<32x64xf32, #tpu.memory_space<vmem>>, %arg3: memref<64x64xf32, #tpu.memory_space<vmem>>, %arg4: memref<4x1x64xf32, #tpu.memory_space<vmem>>, %arg5: memref<64x64xf32, #tpu.memory_space<vmem>>) attributes {dimension_semantics = [], scalar_prefetch = 0 : i64, scratch_operands = 0 : i64, tpu.core_type = #tpu.core_type<tc>} {
    %c0 = arith.constant 0 : index
    %c0_0 = arith.constant 0 : index
    %0 = vector.load %arg1[%c0, %c0_0] : memref<96x32xf32, #tpu.memory_space<vmem>>, vector<96x32xf32>
    %c0_1 = arith.constant 0 : index
    %c0_2 = arith.constant 0 : index
    %1 = vector.load %arg0[%c0_1, %c0_2] : memref<64x96xf32, #tpu.memory_space<vmem>>, vector<64x96xf32>
    %cst = arith.constant dense<0.000000e+00> : vector<64x32xf32>
    %2 = tpu.matmul %1, %0, %cst {dimension_numbers = #tpu.dot_dimension_numbers<[1], [0], [0], [1], [0, 0, 1, 1], [], []>} : vector<64x96xf32>, vector<96x32xf32>, vector<64x32xf32> -> vector<64x32xf32>
    %3 = vector.extract_strided_slice %0 {offsets = [0, 0], sizes = [64, 32], strides = [1, 1]} : vector<96x32xf32> to vector<64x32xf32>
    %4 = arith.addf %3, %2 : vector<64x32xf32>
    %c0_3 = arith.constant 0 : index
    %c0_4 = arith.constant 0 : index
    %5 = vector.load %arg2[%c0_3, %c0_4] : memref<32x64xf32, #tpu.memory_space<vmem>>, vector<32x64xf32>
    %cst_5 = arith.constant dense<0.000000e+00> : vector<64x64xf32>
    %6 = tpu.matmul %4, %5, %cst_5 {dimension_numbers = #tpu.dot_dimension_numbers<[1], [0], [0], [1], [0, 0, 1, 1], [], []>} : vector<64x32xf32>, vector<32x64xf32>, vector<64x64xf32> -> vector<64x64xf32>
    %c0_6 = arith.constant 0 : index
    %c0_7 = arith.constant 0 : index
    %c0_8 = arith.constant 0 : index
    %7 = vector.load %arg4[%c0_6, %c0_7, %c0_8] : memref<4x1x64xf32, #tpu.memory_space<vmem>>, vector<1x1x64xf32>
    %8 = vector.shape_cast %7 : vector<1x1x64xf32> to vector<1x64xf32>
    %9 = vector.broadcast %8 : vector<1x64xf32> to vector<64x64xf32>
    %10 = arith.mulf %6, %9 : vector<64x64xf32>
    %c1 = arith.constant 1 : index
    %c0_9 = arith.constant 0 : index
    %c0_10 = arith.constant 0 : index
    %11 = vector.load %arg4[%c1, %c0_9, %c0_10] : memref<4x1x64xf32, #tpu.memory_space<vmem>>, vector<1x1x64xf32>
    %12 = vector.shape_cast %11 : vector<1x1x64xf32> to vector<1x64xf32>
    %13 = vector.broadcast %12 : vector<1x64xf32> to vector<64x64xf32>
    %14 = arith.addf %10, %13 : vector<64x64xf32>
    %cst_11 = arith.constant 0.000000e+00 : f32
    %15 = vector.broadcast %cst_11 : f32 to vector<64x64xf32>
    %16 = arith.maximumf %14, %15 : vector<64x64xf32>
    %c0_12 = arith.constant 0 : index
    %c0_13 = arith.constant 0 : index
    %17 = vector.load %arg3[%c0_12, %c0_13] : memref<64x64xf32, #tpu.memory_space<vmem>>, vector<64x64xf32>
    %cst_14 = arith.constant dense<0.000000e+00> : vector<64x64xf32>
    %18 = tpu.matmul %16, %17, %cst_14 {dimension_numbers = #tpu.dot_dimension_numbers<[1], [0], [0], [1], [0, 0, 1, 1], [], []>} : vector<64x64xf32>, vector<64x64xf32>, vector<64x64xf32> -> vector<64x64xf32>
    %c2 = arith.constant 2 : index
    %c0_15 = arith.constant 0 : index
    %c0_16 = arith.constant 0 : index
    %19 = vector.load %arg4[%c2, %c0_15, %c0_16] : memref<4x1x64xf32, #tpu.memory_space<vmem>>, vector<1x1x64xf32>
    %20 = vector.shape_cast %19 : vector<1x1x64xf32> to vector<1x64xf32>
    %21 = vector.broadcast %20 : vector<1x64xf32> to vector<64x64xf32>
    %22 = arith.mulf %18, %21 : vector<64x64xf32>
    %c3 = arith.constant 3 : index
    %c0_17 = arith.constant 0 : index
    %c0_18 = arith.constant 0 : index
    %23 = vector.load %arg4[%c3, %c0_17, %c0_18] : memref<4x1x64xf32, #tpu.memory_space<vmem>>, vector<1x1x64xf32>
    %24 = vector.shape_cast %23 : vector<1x1x64xf32> to vector<1x64xf32>
    %25 = vector.broadcast %24 : vector<1x64xf32> to vector<64x64xf32>
    %26 = arith.addf %22, %25 : vector<64x64xf32>
    %cst_19 = arith.constant 0.000000e+00 : f32
    %27 = vector.broadcast %cst_19 : f32 to vector<64x64xf32>
    %28 = arith.maximumf %26, %27 : vector<64x64xf32>
    %c0_20 = arith.constant 0 : index
    %c0_21 = arith.constant 0 : index
    %29 = vector.load %arg5[%c0_20, %c0_21] : memref<64x64xf32, #tpu.memory_space<vmem>>, vector<64x64xf32>
    tpu.vector_store %arg5[%c0_20, %c0_21], %28 {strides = array<i32>} : memref<64x64xf32, #tpu.memory_space<vmem>>, vector<64x64xf32>,
    return
  }
}

module attributes {stable_mosaic.version = 11 : i64} {
  func.func @_gin_layer_kernel(%arg0: memref<48x64xf32, #tpu.memory_space<vmem>>, %arg1: memref<64x64xf32, #tpu.memory_space<vmem>>, %arg2: memref<64x64xf32, #tpu.memory_space<vmem>>, %arg3: memref<64x64xf32, #tpu.memory_space<vmem>>, %arg4: memref<4x1x64xf32, #tpu.memory_space<vmem>>, %arg5: memref<48x64xf32, #tpu.memory_space<vmem>>) attributes {dimension_semantics = [], scalar_prefetch = 0 : i64, scratch_operands = 0 : i64, tpu.core_type = #tpu.core_type<tc>} {
    %c0 = arith.constant 0 : index
    %c0_0 = arith.constant 0 : index
    %0 = vector.load %arg1[%c0, %c0_0] : memref<64x64xf32, #tpu.memory_space<vmem>>, vector<64x64xf32>
    %c0_1 = arith.constant 0 : index
    %c0_2 = arith.constant 0 : index
    %1 = vector.load %arg0[%c0_1, %c0_2] : memref<48x64xf32, #tpu.memory_space<vmem>>, vector<48x64xf32>
    %cst = arith.constant dense<0.000000e+00> : vector<48x64xf32>
    %2 = tpu.matmul %1, %0, %cst {dimension_numbers = #tpu.dot_dimension_numbers<[1], [0], [0], [1], [0, 0, 1, 1], [], []>} : vector<48x64xf32>, vector<64x64xf32>, vector<48x64xf32> -> vector<48x64xf32>
    %3 = vector.extract_strided_slice %0 {offsets = [0, 0], sizes = [48, 64], strides = [1, 1]} : vector<64x64xf32> to vector<48x64xf32>
    %4 = arith.addf %3, %2 : vector<48x64xf32>
    %c0_3 = arith.constant 0 : index
    %c0_4 = arith.constant 0 : index
    %5 = vector.load %arg2[%c0_3, %c0_4] : memref<64x64xf32, #tpu.memory_space<vmem>>, vector<64x64xf32>
    %cst_5 = arith.constant dense<0.000000e+00> : vector<48x64xf32>
    %6 = tpu.matmul %4, %5, %cst_5 {dimension_numbers = #tpu.dot_dimension_numbers<[1], [0], [0], [1], [0, 0, 1, 1], [], []>} : vector<48x64xf32>, vector<64x64xf32>, vector<48x64xf32> -> vector<48x64xf32>
    %c0_6 = arith.constant 0 : index
    %c0_7 = arith.constant 0 : index
    %c0_8 = arith.constant 0 : index
    %7 = vector.load %arg4[%c0_6, %c0_7, %c0_8] : memref<4x1x64xf32, #tpu.memory_space<vmem>>, vector<1x1x64xf32>
    %8 = vector.shape_cast %7 : vector<1x1x64xf32> to vector<1x64xf32>
    %9 = vector.broadcast %8 : vector<1x64xf32> to vector<48x64xf32>
    %10 = arith.mulf %6, %9 : vector<48x64xf32>
    %c1 = arith.constant 1 : index
    %c0_9 = arith.constant 0 : index
    %c0_10 = arith.constant 0 : index
    %11 = vector.load %arg4[%c1, %c0_9, %c0_10] : memref<4x1x64xf32, #tpu.memory_space<vmem>>, vector<1x1x64xf32>
    %12 = vector.shape_cast %11 : vector<1x1x64xf32> to vector<1x64xf32>
    %13 = vector.broadcast %12 : vector<1x64xf32> to vector<48x64xf32>
    %14 = arith.addf %10, %13 : vector<48x64xf32>
    %cst_11 = arith.constant 0.000000e+00 : f32
    %15 = vector.broadcast %cst_11 : f32 to vector<48x64xf32>
    %16 = arith.maximumf %14, %15 : vector<48x64xf32>
    %c0_12 = arith.constant 0 : index
    %c0_13 = arith.constant 0 : index
    %17 = vector.load %arg3[%c0_12, %c0_13] : memref<64x64xf32, #tpu.memory_space<vmem>>, vector<64x64xf32>
    %cst_14 = arith.constant dense<0.000000e+00> : vector<48x64xf32>
    %18 = tpu.matmul %16, %17, %cst_14 {dimension_numbers = #tpu.dot_dimension_numbers<[1], [0], [0], [1], [0, 0, 1, 1], [], []>} : vector<48x64xf32>, vector<64x64xf32>, vector<48x64xf32> -> vector<48x64xf32>
    %c2 = arith.constant 2 : index
    %c0_15 = arith.constant 0 : index
    %c0_16 = arith.constant 0 : index
    %19 = vector.load %arg4[%c2, %c0_15, %c0_16] : memref<4x1x64xf32, #tpu.memory_space<vmem>>, vector<1x1x64xf32>
    %20 = vector.shape_cast %19 : vector<1x1x64xf32> to vector<1x64xf32>
    %21 = vector.broadcast %20 : vector<1x64xf32> to vector<48x64xf32>
    %22 = arith.mulf %18, %21 : vector<48x64xf32>
    %c3 = arith.constant 3 : index
    %c0_17 = arith.constant 0 : index
    %c0_18 = arith.constant 0 : index
    %23 = vector.load %arg4[%c3, %c0_17, %c0_18] : memref<4x1x64xf32, #tpu.memory_space<vmem>>, vector<1x1x64xf32>
    %24 = vector.shape_cast %23 : vector<1x1x64xf32> to vector<1x64xf32>
    %25 = vector.broadcast %24 : vector<1x64xf32> to vector<48x64xf32>
    %26 = arith.addf %22, %25 : vector<48x64xf32>
    %c0_19 = arith.constant 0 : index
    %c0_20 = arith.constant 0 : index
    %27 = vector.load %arg5[%c0_19, %c0_20] : memref<48x64xf32, #tpu.memory_space<vmem>>, vector<48x64xf32>
    tpu.vector_store %arg5[%c0_19, %c0_20], %26 {strides = array<i32>} : memref<48x64xf32, #tpu.memory_space<vmem>>, vector<48x64xf32>,
    return
  }
}

module attributes {stable_mosaic.version = 11 : i64} {
  func.func @_predictor_kernel(%arg0: i32, %arg1: memref<64x256xf32, #tpu.memory_space<vmem>>, %arg2: memref<64x256xf32, #tpu.memory_space<vmem>>, %arg3: memref<2x64x64xf32, #tpu.memory_space<vmem>>, %arg4: memref<3x64x1xf32, #tpu.memory_space<vmem>>, %arg5: memref<1x1xf32, #tpu.memory_space<smem>>, %arg6: memref<1x256xf32, #tpu.memory_space<vmem>>) attributes {dimension_semantics = [#tpu.dimension_semantics<parallel>], iteration_bounds = array<i64: 3>, scalar_prefetch = 0 : i64, scratch_operands = 0 : i64, tpu.core_type = #tpu.core_type<tc>, window_params = [{transform_indices = @transform_0, window_bounds = array<i64: 64, 256>}, {transform_indices = @transform_1, window_bounds = array<i64: 64, 256>}, {pipeline_mode = #tpu.pipeline_mode<synchronous>, transform_indices = @transform_2, window_bounds = array<i64: 2, 64, 64>}, {pipeline_mode = #tpu.pipeline_mode<synchronous>, transform_indices = @transform_3, window_bounds = array<i64: 3, 64, 1>}, {transform_indices = @transform_4, window_bounds = array<i64: 1, 1>}, {transform_indices = @transform_5, window_bounds = array<i64: 1, 256>}]} {
    %c0 = arith.constant 0 : index
    %c0_0 = arith.constant 0 : index
    %0 = vector.load %arg1[%c0, %c0_0] : memref<64x256xf32, #tpu.memory_space<vmem>>, vector<64x256xf32>
    %c0_1 = arith.constant 0 : index
    %c0_2 = arith.constant 0 : index
    %1 = vector.load %arg2[%c0_1, %c0_2] : memref<64x256xf32, #tpu.memory_space<vmem>>, vector<64x256xf32>
    %2 = arith.mulf %0, %1 : vector<64x256xf32>
    %c0_3 = arith.constant 0 : index
    %c0_4 = arith.constant 0 : index
    %c0_5 = arith.constant 0 : index
    %3 = vector.load %arg3[%c0_3, %c0_4, %c0_5] : memref<2x64x64xf32, #tpu.memory_space<vmem>>, vector<1x64x64xf32>
    %4 = vector.shape_cast %3 : vector<1x64x64xf32> to vector<64x64xf32>
    %cst = arith.constant dense<0.000000e+00> : vector<64x256xf32>
    %5 = tpu.matmul %4, %2, %cst {dimension_numbers = #tpu.dot_dimension_numbers<[1], [0], [0], [1], [0, 0, 1, 1], [], []>} : vector<64x64xf32>, vector<64x256xf32>, vector<64x256xf32> -> vector<64x256xf32>
    %c0_6 = arith.constant 0 : index
    %c0_7 = arith.constant 0 : index
    %c0_8 = arith.constant 0 : index
    %6 = vector.load %arg4[%c0_6, %c0_7, %c0_8] : memref<3x64x1xf32, #tpu.memory_space<vmem>>, vector<1x64x1xf32>
    %7 = vector.shape_cast %6 : vector<1x64x1xf32> to vector<64x1xf32>
    %8 = vector.broadcast %7 : vector<64x1xf32> to vector<64x256xf32>
    %9 = arith.addf %5, %8 : vector<64x256xf32>
    %cst_9 = arith.constant 0.000000e+00 : f32
    %10 = vector.broadcast %cst_9 : f32 to vector<64x256xf32>
    %11 = arith.maximumf %9, %10 : vector<64x256xf32>
    %c1 = arith.constant 1 : index
    %c0_10 = arith.constant 0 : index
    %c0_11 = arith.constant 0 : index
    %12 = vector.load %arg3[%c1, %c0_10, %c0_11] : memref<2x64x64xf32, #tpu.memory_space<vmem>>, vector<1x64x64xf32>
    %13 = vector.shape_cast %12 : vector<1x64x64xf32> to vector<64x64xf32>
    %cst_12 = arith.constant dense<0.000000e+00> : vector<64x256xf32>
    %14 = tpu.matmul %13, %11, %cst_12 {dimension_numbers = #tpu.dot_dimension_numbers<[1], [0], [0], [1], [0, 0, 1, 1], [], []>} : vector<64x64xf32>, vector<64x256xf32>, vector<64x256xf32> -> vector<64x256xf32>
    %c1_13 = arith.constant 1 : index
    %c0_14 = arith.constant 0 : index
    %c0_15 = arith.constant 0 : index
    %15 = vector.load %arg4[%c1_13, %c0_14, %c0_15] : memref<3x64x1xf32, #tpu.memory_space<vmem>>, vector<1x64x1xf32>
    %16 = vector.shape_cast %15 : vector<1x64x1xf32> to vector<64x1xf32>
    %17 = vector.broadcast %16 : vector<64x1xf32> to vector<64x256xf32>
    %18 = arith.addf %14, %17 : vector<64x256xf32>
    %cst_16 = arith.constant 0.000000e+00 : f32
    %19 = vector.broadcast %cst_16 : f32 to vector<64x256xf32>
    %20 = arith.maximumf %18, %19 : vector<64x256xf32>
    %c2 = arith.constant 2 : index
    %c0_17 = arith.constant 0 : index
    %c0_18 = arith.constant 0 : index
    %21 = vector.load %arg4[%c2, %c0_17, %c0_18] : memref<3x64x1xf32, #tpu.memory_space<vmem>>, vector<1x64x1xf32>
    %22 = vector.shape_cast %21 : vector<1x64x1xf32> to vector<64x1xf32>
    %23 = vector.broadcast %22 : vector<64x1xf32> to vector<64x256xf32>
    %24 = arith.mulf %20, %23 : vector<64x256xf32>
    %cst_19 = arith.constant dense<0.000000e+00> : vector<256xf32>
    %25 = vector.multi_reduction <add>, %24, %cst_19 [0] : vector<64x256xf32> to vector<256xf32>
    %26 = vector.shape_cast %25 : vector<256xf32> to vector<1x256xf32>
    %c0_20 = arith.constant 0 : index
    %c0_21 = arith.constant 0 : index
    %27 = memref.load %arg5[%c0_20, %c0_21] : memref<1x1xf32, #tpu.memory_space<smem>>
    %28 = vector.broadcast %27 : f32 to vector<1x256xf32>
    %29 = arith.addf %26, %28 : vector<1x256xf32>
    %c0_22 = arith.constant 0 : index
    %c0_23 = arith.constant 0 : index
    %30 = vector.load %arg6[%c0_22, %c0_23] : memref<1x256xf32, #tpu.memory_space<vmem>>, vector<1x256xf32>
    tpu.vector_store %arg6[%c0_22, %c0_23], %29 {strides = array<i32>} : memref<1x256xf32, #tpu.memory_space<vmem>>, vector<1x256xf32>,
    return
  }
  func.func @transform_0(%arg0: i32) -> (i32, i32) {
    %c0_i32 = arith.constant 0 : i32
    %c0_i32_0 = arith.constant 0 : i32
    return %c0_i32, %arg0 : i32, i32
  }
  func.func @transform_1(%arg0: i32) -> (i32, i32) {
    %c0_i32 = arith.constant 0 : i32
    %c0_i32_0 = arith.constant 0 : i32
    return %c0_i32, %arg0 : i32, i32
  }
  func.func @transform_2(%arg0: i32) -> (i32, i32, i32) {
    %c0_i32 = arith.constant 0 : i32
    %c0_i32_0 = arith.constant 0 : i32
    %c0_i32_1 = arith.constant 0 : i32
    %c0_i32_2 = arith.constant 0 : i32
    return %c0_i32, %c0_i32_0, %c0_i32_1 : i32, i32, i32
  }
  func.func @transform_3(%arg0: i32) -> (i32, i32, i32) {
    %c0_i32 = arith.constant 0 : i32
    %c0_i32_0 = arith.constant 0 : i32
    %c0_i32_1 = arith.constant 0 : i32
    %c0_i32_2 = arith.constant 0 : i32
    return %c0_i32, %c0_i32_0, %c0_i32_1 : i32, i32, i32
  }
  func.func @transform_4(%arg0: i32) -> (i32, i32) {
    %c0_i32 = arith.constant 0 : i32
    %c0_i32_0 = arith.constant 0 : i32
    %c0_i32_1 = arith.constant 0 : i32
    return %c0_i32, %c0_i32_0 : i32, i32
  }
  func.func @transform_5(%arg0: i32) -> (i32, i32) {
    %c0_i32 = arith.constant 0 : i32
    %c0_i32_0 = arith.constant 0 : i32
    return %c0_i32, %arg0 : i32, i32
  }
}

</mosaic_0001>

<bundles_post_ra>
// kernel: gin_link_pred.3
= control target key start
LH: loop header
LB: loop body
LE: loop exit
PB: predicated region body
PF: predicated region fallthrough
CT: control target
= control target key end

     0   :  { %vm40_vm0 = vcmask 785408   ;;  %vm182_vm1 = vcmask 261120   ;;  %vm359_vm2 = vcmask 523264   ;;  %s978_s1 = inlined_call_operand.vmem [shape: f32[96,32], index: 1, kind: input, shape index: {}]   ;;  %s979_s0 = inlined_call_operand.vmem [shape: f32[64,96], index: 0, kind: input, shape index: {}]   ;;  %s980_s2 = inlined_call_operand.vmem [shape: f32[32,64], index: 2, kind: input, shape index: {}]   ;;  %s981_s3 = inlined_call_operand.vmem [shape: f32[64,64], index: 3, kind: input, shape index: {}]   ;;  %s982_s4 = inlined_call_operand.vmem [shape: f32[4,1,64], index: 4, kind: input, shape index: {}]   ;;  %s983_s5 = inlined_call_operand.vmem [shape: f32[64,64], index: 5, kind: output, shape index: {}]  }
   0x1   :  { %v785_v0 = vld [vmem:[%s978_s1] sm:$0xff]  ;;  %v790_v1 = vld [vmem:[%s978_s1 + $0x8] sm:$0xff]  ;;  %v795_v2 = vld [vmem:[%s978_s1 + $0x10] sm:$0xff] }
   0x2   :  { %v704_v3 = vpack.c.bf16 %v790_v1, %v785_v0  ;;  %v802_v4 = vld [vmem:[%s978_s1 + $0x18] sm:$0xff]  ;;  %v809_v6 = vld [vmem:[%s978_s1 + $0x20] sm:$0xff]  ;;  %v814_v7 = vld [vmem:[%s978_s1 + $0x28] sm:$0xff] }
   0x3   :  { %v708_v5 = vpack.c.bf16 %v802_v4, %v795_v2  ;;  %v32_v8 = vld [vmem:[%s979_s0] sm:$0xff]  ;;  %v712_v9 = vpack.c.bf16 %v814_v7, %v809_v6  ;;  %v825_v10 = vld [vmem:[%s978_s1 + $0x30] sm:$0xff]  ;;  %v830_v11 = vld [vmem:[%s978_s1 + $0x38] sm:$0xff] }
   0x4   :  { %705 = vmatprep.subr.bf16.mxu0 %v704_v3  ;;  %644 = vmatprep.mubr.msk.f32.mxu0 %vm40_vm0, %v32_v8  ;;  %v178_v12 = vld [vmem:[%s980_s2] sm:$0xff]  ;;  %v179_v13 = vld [vmem:[%s980_s2 + $0x8] sm:$0xff]  ;;  %v716_v15 = vpack.c.bf16 %v830_v11, %v825_v10  ;;  %v30_v19 = vld [vmem:[%s978_s1 + $0x50] sm:$0xff] }
   0x5   :  { %707 = vmatpush3.bf16.msra.mxu0 %v704_v3  ;;  %v728_v14 = vpack.c.bf16 %v179_v13, %v178_v12  ;;  %v28_v16 = vld [vmem:[%s978_s1 + $0x40] sm:$0xff]  ;;  %v29_v17 = vld [vmem:[%s978_s1 + $0x48] sm:$0xff]  ;;  %v31_v20 = vld [vmem:[%s978_s1 + $0x58] sm:$0xff] }
   0x6   :  { %709 = vmatprep.subr.bf16.mxu0 %v708_v5  ;;  %v720_v18 = vpack.c.bf16 %v29_v17, %v28_v16  ;;  %v724_v21 = vpack.c.bf16 %v31_v20, %v30_v19  ;;  %v33_v22 = vld [vmem:[%s979_s0 + $0x8] sm:$0xff]  ;;  %v34_v23 = vld [vmem:[%s979_s0 + $0x10] sm:$0xff]  ;;  %v35_v24 = vld [vmem:[%s979_s0 + $0x18] sm:$0xff] }
   0x7   :  { %729 = vmatprep.subr.bf16.mxu1 %v728_v14  ;;  %v36_v25 = vld [vmem:[%s979_s0 + $0x20] sm:$0xff]  ;;  %v37_v26 = vld [vmem:[%s979_s0 + $0x28] sm:$0xff]  ;;  %v38_v27 = vld [vmem:[%s979_s0 + $0x30] sm:$0xff] }
   0x8   :  { %731 = vmatpush3.bf16.msra.mxu1 %v728_v14  ;;  %v39_v28 = vld [vmem:[%s979_s0 + $0x38] sm:$0xff]  ;;  %v180_v29 = vld [vmem:[%s980_s2 + $0x10] sm:$0xff]  ;;  %v351_v32 = vld [vmem:[%s981_s3] sm:$0xff] }
   0x9   :  { %711 = vmatpush3.bf16.msra.mxu0 %v708_v5  ;;  %v181_v30 = vld [vmem:[%s980_s2 + $0x18] sm:$0xff]  ;;  %v352_v33 = vld [vmem:[%s981_s3 + $0x8] sm:$0xff]  ;;  %v353_v36 = vld [vmem:[%s981_s3 + $0x10] sm:$0xff] }
   0xa   :  { %713 = vmatprep.subr.bf16.mxu0 %v712_v9  ;;  %v732_v31 = vpack.c.bf16 %v181_v30, %v180_v29  ;;  %v736_v34 = vpack.c.bf16 %v352_v33, %v351_v32  ;;  %v354_v37 = vld [vmem:[%s981_s3 + $0x18] sm:$0xff]  ;;  %v355_v54 = vld [vmem:[%s981_s3 + $0x20] sm:$0xff]  ;;  %v356_v55 = vld [vmem:[%s981_s3 + $0x28] sm:$0xff] }
   0xb   :  { %v740_v41 = vpack.c.bf16 %v354_v37, %v353_v36  ;;  %v744_v56 = vpack.c.bf16 %v356_v55, %v355_v54  ;;  %v357_v57 = vld [vmem:[%s981_s3 + $0x30] sm:$0xff]  ;;  %v358_v58 = vld [vmem:[%s981_s3 + $0x38] sm:$0xff]  ;;  %v557_v60 = vld [vmem:[%s982_s4] ss:$0 sm:$0xff] }
   0xc   :  { %733 = vmatprep.subr.bf16.mxu1 %v732_v31  ;;  %v748_v59 = vpack.c.bf16 %v358_v58, %v357_v57  ;;  %v559_v62 = vld [vmem:[%s982_s4 + $0x1] ss:$0 sm:$0xff]  ;;  %v569_v30 = vld [vmem:[%s982_s4 + $0x2] ss:$0 sm:$0xff]  ;;  %v571_v32 = vld [vmem:[%s982_s4 + $0x3] ss:$0 sm:$0xff] }
   0xd   :  { %715 = vmatpush3.bf16.msra.mxu0 %v712_v9  ;;  %735 = vmatpush3.bf16.msra.mxu1 %v732_v31 }
   0xe   :  { %717 = vmatprep.subr.bf16.mxu0 %v716_v15  ;;  %737 = vmatprep.subr.bf16.mxu1 %v736_v34 }
  0x11   :  { %719 = vmatpush3.bf16.msra.mxu0 %v716_v15 }
  0x12   :  { %721 = vmatprep.subr.bf16.mxu0 %v720_v18 }
  0x15   :  { %723 = vmatpush3.bf16.msra.mxu0 %v720_v18 }
  0x16   :  { %725 = vmatprep.subr.bf16.mxu0 %v724_v21 }
  0x19   :  { %727 = vmatpush3.bf16.msra.mxu0 %v724_v21 }
  0x1c   :  { %645 = vmatmul.mubr.msk.f32.vlgmr.msra.gmra.mrb[0].mxu0 %vm40_vm0, %v33_v22 }
  0x1d   :  { %647 = vmatprep.mubr.msk.f32.mxu0 %vm40_vm0, %v34_v23 }
  0x20   :  { %648 = vmatmul.mubr.msk.f32.gmra.mrb[2].mxu0 %vm40_vm0, %v35_v24 }
  0x21   :  { %650 = vmatprep.mubr.msk.f32.mxu0 %vm40_vm0, %v36_v25 }
  0x24   :  { %651 = vmatmul.mubr.msk.f32.gmra.mrb[4].mxu0 %vm40_vm0, %v37_v26 }
  0x25   :  { %653 = vmatprep.mubr.msk.f32.mxu0 %vm40_vm0, %v38_v27 }
  0x28   :  { %654 = vmatmul.mubr.msk.f32.gmra.mrb[6].mxu0 %vm40_vm0, %v39_v28 }
  0xef   :  { %v646_v35 = vpop.f32.mrb[0].mxu0 }
  0xf0   :  { %v131_v38 = vpop.f32.mrb[1].mxu0  ;;  %v171_v40 = vadd.f32 %v646_v35, %v790_v1 }
  0xf1   :  { %v170_v39 = vadd.f32 %v131_v38, %v785_v0 }
  0xf3   :  { %v649_v42 = vpop.f32.mrb[2].mxu0  ;;  %664 = vmatprep.mubr.msk.f32.mxu1 %vm182_vm1, %v170_v39 }
  0xf4   :  { %v141_v43 = vpop.f32.mrb[3].mxu0  ;;  %665 = vmatmul.mubr.msk.f32.vlgmr.msra.gmra.mrb[0].mxu1 %vm182_vm1, %v171_v40  ;;  %v173_v45 = vadd.f32 %v649_v42, %v802_v4 }
  0xf5   :  { %v172_v44 = vadd.f32 %v141_v43, %v795_v2  ;;  %739 = vmatpush3.bf16.msra.mxu1 %v736_v34 }
  0xf6   :  { %741 = vmatprep.subr.bf16.mxu1 %v740_v41 }
  0xf7   :  { %v652_v46 = vpop.f32.mrb[4].mxu0  ;;  %667 = vmatprep.mubr.msk.f32.mxu1 %vm182_vm1, %v172_v44 }
  0xf8   :  { %v151_v47 = vpop.f32.mrb[5].mxu0  ;;  %668 = vmatmul.mubr.msk.f32.gmra.mrb[2].mxu1 %vm182_vm1, %v173_v45  ;;  %v175_v49 = vadd.f32 %v652_v46, %v814_v7 }
  0xf9   :  { %v174_v48 = vadd.f32 %v151_v47, %v809_v6  ;;  %743 = vmatpush3.bf16.msra.mxu1 %v740_v41 }
  0xfa   :  { %745 = vmatprep.subr.bf16.mxu1 %v744_v56 }
  0xfb   :  { %v655_v50 = vpop.f32.mrb[6].mxu0  ;;  %670 = vmatprep.mubr.msk.f32.mxu1 %vm182_vm1, %v174_v48 }
  0xfc   :  { %v161_v51 = vpop.f32.mrb[7].mxu0  ;;  %671 = vmatmul.mubr.msk.f32.gmra.mrb[4].mxu1 %vm182_vm1, %v175_v49  ;;  %v177_v53 = vadd.f32 %v655_v50, %v830_v11 }
  0xfd   :  { %v176_v52 = vadd.f32 %v161_v51, %v825_v10  ;;  %747 = vmatpush3.bf16.msra.mxu1 %v744_v56 }
  0xfe   :  { %749 = vmatprep.subr.bf16.mxu1 %v748_v59 }
  0xff   :  { %673 = vmatprep.mubr.msk.f32.mxu1 %vm182_vm1, %v176_v52 }
 0x100   :  { %674 = vmatmul.mubr.msk.f32.gmra.mrb[6].mxu1 %vm182_vm1, %v177_v53 }
 0x101   :  { %751 = vmatpush3.bf16.msra.mxu1 %v748_v59 }
 0x1c7   :  { %v666_v61 = vpop.f32.mrb[0].mxu1 }
 0x1c8   :  { %v320_v63 = vmul.f32 %v666_v61, %v557_v60  ;;  %v273_v0 = vpop.f32.mrb[1].mxu1 }
 0x1c9   :  { %v319_v1 = vmul.f32 %v557_v60, %v273_v0 }
 0x1ca   :  { %v336_v2 = vadd.f32 %v559_v62, %v320_v63 }
 0x1cb   :  { %v335_v3 = vadd.f32 %v559_v62, %v319_v1  ;;  %v669_v4 = vpop.f32.mrb[2].mxu1 }
 0x1cc   :  { %v322_v5 = vmul.f32 %v669_v4, %v557_v60  ;;  %v283_v6 = vpop.f32.mrb[3].mxu1  ;;  %v344_v9 = vmax.f32 %v336_v2, 0.0 }
 0x1cd   :  { %v343_v7 = vmax.f32 %v335_v3, 0.0  ;;  %v321_v8 = vmul.f32 %v557_v60, %v283_v6 }
 0x1ce   :  { %v338_v10 = vadd.f32 %v559_v62, %v322_v5 }
 0x1cf   :  { %v337_v11 = vadd.f32 %v559_v62, %v321_v8  ;;  %v672_v12 = vpop.f32.mrb[4].mxu1  ;;  %692 = vmatprep.mubr.msk.f32.mxu1 %vm359_vm2, %v343_v7 }
 0x1d0   :  { %v324_v13 = vmul.f32 %v672_v12, %v557_v60  ;;  %v293_v14 = vpop.f32.mrb[5].mxu1  ;;  %693 = vmatmul.mubr.msk.f32.vlgmr.msra.gmra.mrb[8].mxu1 %vm359_vm2, %v344_v9  ;;  %v346_v17 = vmax.f32 %v338_v10, 0.0 }
 0x1d1   :  { %v345_v15 = vmax.f32 %v337_v11, 0.0  ;;  %v323_v16 = vmul.f32 %v557_v60, %v293_v14 }
 0x1d2   :  { %v340_v18 = vadd.f32 %v559_v62, %v324_v13 }
 0x1d3   :  { %v339_v19 = vadd.f32 %v559_v62, %v323_v16  ;;  %v675_v20 = vpop.f32.mrb[6].mxu1  ;;  %695 = vmatprep.mubr.msk.f32.mxu1 %vm359_vm2, %v345_v15 }
 0x1d4   :  { %v326_v21 = vmul.f32 %v675_v20, %v557_v60  ;;  %v303_v22 = vpop.f32.mrb[7].mxu1  ;;  %696 = vmatmul.mubr.msk.f32.gmra.mrb[10].mxu1 %vm359_vm2, %v346_v17  ;;  %v348_v25 = vmax.f32 %v340_v18, 0.0 }
 0x1d5   :  { %v347_v23 = vmax.f32 %v339_v19, 0.0  ;;  %v325_v24 = vmul.f32 %v557_v60, %v303_v22 }
 0x1d6   :  { %v342_v26 = vadd.f32 %v559_v62, %v326_v21 }
 0x1d7   :  { %v341_v27 = vadd.f32 %v559_v62, %v325_v24  ;;  %698 = vmatprep.mubr.msk.f32.mxu1 %vm359_vm2, %v347_v23 }
 0x1d8   :  { %699 = vmatmul.mubr.msk.f32.gmra.mrb[12].mxu1 %vm359_vm2, %v348_v25  ;;  %v350_v29 = vmax.f32 %v342_v26, 0.0 }
 0x1d9   :  { %v349_v28 = vmax.f32 %v341_v27, 0.0 }
 0x1db   :  { %701 = vmatprep.mubr.msk.f32.mxu1 %vm359_vm2, %v349_v28 }
 0x1dc   :  { %702 = vmatmul.mubr.msk.f32.gmra.mrb[14].mxu1 %vm359_vm2, %v350_v29 }
 0x2a3   :  { %v694_v31 = vpop.f32.mrb[8].mxu1 }
 0x2a4   :  { %v498_v33 = vmul.f32 %v694_v31, %v569_v30  ;;  %v450_v34 = vpop.f32.mrb[9].mxu1 }
 0x2a5   :  { %v497_v35 = vmul.f32 %v569_v30, %v450_v34 }
 0x2a6   :  { %v514_v36 = vadd.f32 %v571_v32, %v498_v33 }
 0x2a7   :  { %v513_v37 = vadd.f32 %v571_v32, %v497_v35  ;;  %v697_v38 = vpop.f32.mrb[10].mxu1 }
 0x2a8   :  { %v522_v39 = vmax.f32 %v514_v36, 0.0  ;;  %v500_v40 = vmul.f32 %v697_v38, %v569_v30  ;;  %v460_v41 = vpop.f32.mrb[11].mxu1 }
 0x2a9   :  { %v521_v42 = vmax.f32 %v513_v37, 0.0  ;;  %v499_v43 = vmul.f32 %v569_v30, %v460_v41 }
 0x2aa   :  { %530 = vst.msk [vmem:[%s983_s5 + $0x8] sm:$0xff] %vm359_vm2, %v522_v39  ;;  %v516_v44 = vadd.f32 %v571_v32, %v500_v40 }
 0x2ab   :  { %529 = vst.msk [vmem:[%s983_s5] sm:$0xff] %vm359_vm2, %v521_v42  ;;  %v515_v45 = vadd.f32 %v571_v32, %v499_v43  ;;  %v700_v46 = vpop.f32.mrb[12].mxu1 }
 0x2ac   :  { %v524_v47 = vmax.f32 %v516_v44, 0.0  ;;  %v502_v48 = vmul.f32 %v700_v46, %v569_v30  ;;  %v470_v49 = vpop.f32.mrb[13].mxu1 }
 0x2ad   :  { %v523_v50 = vmax.f32 %v515_v45, 0.0  ;;  %v501_v51 = vmul.f32 %v569_v30, %v470_v49 }
 0x2ae   :  { %532 = vst.msk [vmem:[%s983_s5 + $0x18] sm:$0xff] %vm359_vm2, %v524_v47  ;;  %v518_v52 = vadd.f32 %v571_v32, %v502_v48 }
 0x2af   :  { %531 = vst.msk [vmem:[%s983_s5 + $0x10] sm:$0xff] %vm359_vm2, %v523_v50  ;;  %v517_v53 = vadd.f32 %v571_v32, %v501_v51  ;;  %v703_v54 = vpop.f32.mrb[14].mxu1 }
 0x2b0   :  { %v526_v55 = vmax.f32 %v518_v52, 0.0  ;;  %v504_v56 = vmul.f32 %v703_v54, %v569_v30  ;;  %v480_v57 = vpop.f32.mrb[15].mxu1 }
 0x2b1   :  { %v525_v58 = vmax.f32 %v517_v53, 0.0  ;;  %v503_v59 = vmul.f32 %v569_v30, %v480_v57 }
 0x2b2   :  { %534 = vst.msk [vmem:[%s983_s5 + $0x28] sm:$0xff] %vm359_vm2, %v526_v55  ;;  %v520_v60 = vadd.f32 %v571_v32, %v504_v56 }
 0x2b3   :  { %533 = vst.msk [vmem:[%s983_s5 + $0x20] sm:$0xff] %vm359_vm2, %v525_v58  ;;  %v519_v61 = vadd.f32 %v571_v32, %v503_v59 }
 0x2b4   :  { %v528_v62 = vmax.f32 %v520_v60, 0.0 }
 0x2b5   :  { %v527_v63 = vmax.f32 %v519_v61, 0.0 }
 0x2b6   :  { %536 = vst.msk [vmem:[%s983_s5 + $0x38] sm:$0xff] %vm359_vm2, %v528_v62 }
 0x2b7   :  { %535 = vst.msk [vmem:[%s983_s5 + $0x30] sm:$0xff] %vm359_vm2, %v527_v63 }

// kernel: gin_link_pred.4
= control target key start
LH: loop header
LB: loop body
LE: loop exit
PB: predicated region body
PF: predicated region fallthrough
CT: control target
= control target key end

     0   :  { %vm34_vm0 = vcmask 523264   ;;  %s863_s1 = inlined_call_operand.vmem [shape: f32[64,64], index: 1, kind: input, shape index: {}]   ;;  %s864_s0 = inlined_call_operand.vmem [shape: f32[48,64], index: 0, kind: input, shape index: {}]   ;;  %s865_s2 = inlined_call_operand.vmem [shape: f32[64,64], index: 2, kind: input, shape index: {}]   ;;  %s866_s3 = inlined_call_operand.vmem [shape: f32[64,64], index: 3, kind: input, shape index: {}]   ;;  %s867_s4 = inlined_call_operand.vmem [shape: f32[4,1,64], index: 4, kind: input, shape index: {}]   ;;  %s868_s5 = inlined_call_operand.vmem [shape: f32[48,64], index: 5, kind: output, shape index: {}]  }
   0x1   :  { %v698_v0 = vld [vmem:[%s863_s1] sm:$0xff]  ;;  %v703_v1 = vld [vmem:[%s863_s1 + $0x8] sm:$0xff]  ;;  %v708_v2 = vld [vmem:[%s863_s1 + $0x10] sm:$0xff] }
   0x2   :  { %v609_v3 = vpack.c.bf16 %v703_v1, %v698_v0  ;;  %v715_v4 = vld [vmem:[%s863_s1 + $0x18] sm:$0xff]  ;;  %v722_v6 = vld [vmem:[%s863_s1 + $0x20] sm:$0xff]  ;;  %v727_v7 = vld [vmem:[%s863_s1 + $0x28] sm:$0xff] }
   0x3   :  { %v613_v5 = vpack.c.bf16 %v715_v4, %v708_v2  ;;  %v28_v8 = vld [vmem:[%s864_s0] sm:$0xff]  ;;  %v617_v10 = vpack.c.bf16 %v727_v7, %v722_v6  ;;  %v155_v11 = vld [vmem:[%s865_s2 + $0x8] sm:$0xff]  ;;  %v156_v12 = vld [vmem:[%s865_s2 + $0x10] sm:$0xff] }
   0x4   :  { %610 = vmatprep.subr.bf16.mxu0 %v609_v3  ;;  %550 = vmatprep.mubr.msk.f32.mxu0 %vm34_vm0, %v28_v8  ;;  %v154_v9 = vld [vmem:[%s865_s2] sm:$0xff]  ;;  %v157_v13 = vld [vmem:[%s865_s2 + $0x18] sm:$0xff]  ;;  %v26_v14 = vld [vmem:[%s863_s1 + $0x30] sm:$0xff] }
   0x5   :  { %612 = vmatpush3.bf16.msra.mxu0 %v609_v3  ;;  %v27_v15 = vld [vmem:[%s863_s1 + $0x38] sm:$0xff]  ;;  %v625_v16 = vpack.c.bf16 %v155_v11, %v154_v9  ;;  %v629_v17 = vpack.c.bf16 %v157_v13, %v156_v12  ;;  %v158_v18 = vld [vmem:[%s865_s2 + $0x20] sm:$0xff]  ;;  %v159_v19 = vld [vmem:[%s865_s2 + $0x28] sm:$0xff] }
   0x6   :  { %614 = vmatprep.subr.bf16.mxu0 %v613_v5  ;;  %v621_v20 = vpack.c.bf16 %v27_v15, %v26_v14  ;;  %v633_v21 = vpack.c.bf16 %v159_v19, %v158_v18  ;;  %v29_v22 = vld [vmem:[%s864_s0 + $0x8] sm:$0xff]  ;;  %v30_v23 = vld [vmem:[%s864_s0 + $0x10] sm:$0xff]  ;;  %v31_v24 = vld [vmem:[%s864_s0 + $0x18] sm:$0xff] }
   0x7   :  { %626 = vmatprep.subr.bf16.mxu1 %v625_v16  ;;  %v32_v25 = vld [vmem:[%s864_s0 + $0x20] sm:$0xff]  ;;  %v33_v26 = vld [vmem:[%s864_s0 + $0x28] sm:$0xff]  ;;  %v160_v27 = vld [vmem:[%s865_s2 + $0x30] sm:$0xff] }
   0x8   :  { %628 = vmatpush3.bf16.msra.mxu1 %v625_v16  ;;  %v161_v28 = vld [vmem:[%s865_s2 + $0x38] sm:$0xff]  ;;  %v308_v30 = vld [vmem:[%s866_s3] sm:$0xff]  ;;  %v309_v31 = vld [vmem:[%s866_s3 + $0x8] sm:$0xff] }
   0x9   :  { %616 = vmatpush3.bf16.msra.mxu0 %v613_v5  ;;  %630 = vmatprep.subr.bf16.mxu1 %v629_v17  ;;  %v637_v29 = vpack.c.bf16 %v161_v28, %v160_v27  ;;  %v310_v32 = vld [vmem:[%s866_s3 + $0x10] sm:$0xff]  ;;  %v641_v33 = vpack.c.bf16 %v309_v31, %v308_v30  ;;  %v311_v34 = vld [vmem:[%s866_s3 + $0x18] sm:$0xff]  ;;  %v312_v48 = vld [vmem:[%s866_s3 + $0x20] sm:$0xff] }
   0xa   :  { %618 = vmatprep.subr.bf16.mxu0 %v617_v10  ;;  %v645_v35 = vpack.c.bf16 %v311_v34, %v310_v32  ;;  %v313_v49 = vld [vmem:[%s866_s3 + $0x28] sm:$0xff]  ;;  %v314_v51 = vld [vmem:[%s866_s3 + $0x30] sm:$0xff]  ;;  %v315_v52 = vld [vmem:[%s866_s3 + $0x38] sm:$0xff] }
   0xb   :  { %v649_v50 = vpack.c.bf16 %v313_v49, %v312_v48  ;;  %v653_v53 = vpack.c.bf16 %v315_v52, %v314_v51  ;;  %v479_v54 = vld [vmem:[%s867_s4] ss:$0 sm:$0xff]  ;;  %v481_v56 = vld [vmem:[%s867_s4 + $0x1] ss:$0 sm:$0xff]  ;;  %v489_v16 = vld [vmem:[%s867_s4 + $0x2] ss:$0 sm:$0xff] }
   0xc   :  { %632 = vmatpush3.bf16.msra.mxu1 %v629_v17  ;;  %v491_v18 = vld [vmem:[%s867_s4 + $0x3] ss:$0 sm:$0xff] }
   0xd   :  { %620 = vmatpush3.bf16.msra.mxu0 %v617_v10  ;;  %634 = vmatprep.subr.bf16.mxu1 %v633_v21 }
   0xe   :  { %622 = vmatprep.subr.bf16.mxu0 %v621_v20 }
  0x10   :  { %636 = vmatpush3.bf16.msra.mxu1 %v633_v21 }
  0x11   :  { %624 = vmatpush3.bf16.msra.mxu0 %v621_v20  ;;  %638 = vmatprep.subr.bf16.mxu1 %v637_v29 }
  0x12   :  { %642 = vmatprep.subr.bf16.mxu0 %v641_v33 }
  0x14   :  { %551 = vmatmul.mubr.msk.f32.vlgmr.msra.gmra.mrb[0].mxu0 %vm34_vm0, %v29_v22  ;;  %640 = vmatpush3.bf16.msra.mxu1 %v637_v29 }
  0x15   :  { %553 = vmatprep.mubr.msk.f32.mxu0 %vm34_vm0, %v30_v23  ;;  %657 = vmatprep.subr.bf16.mxu1 %v641_v33 }
  0x16   :  { %644 = vmatpush3.bf16.msra.mxu0 %v641_v33 }
  0x17   :  { %646 = vmatprep.subr.bf16.mxu0 %v645_v35 }
  0x18   :  { %554 = vmatmul.mubr.msk.f32.gmra.mrb[2].mxu0 %vm34_vm0, %v31_v24 }
  0x19   :  { %556 = vmatprep.mubr.msk.f32.mxu0 %vm34_vm0, %v32_v25 }
  0x1a   :  { %648 = vmatpush3.bf16.msra.mxu0 %v645_v35 }
  0x1b   :  { %650 = vmatprep.subr.bf16.mxu0 %v649_v50 }
  0x1c   :  { %557 = vmatmul.mubr.msk.f32.gmra.mrb[4].mxu0 %vm34_vm0, %v33_v26 }
  0x1e   :  { %652 = vmatpush3.bf16.msra.mxu0 %v649_v50 }
  0x1f   :  { %654 = vmatprep.subr.bf16.mxu0 %v653_v53 }
  0x22   :  { %656 = vmatpush3.bf16.msra.mxu0 %v653_v53 }
  0xe7   :  { %v552_v36 = vpop.f32.mrb[0].mxu0 }
  0xe8   :  { %v119_v37 = vpop.f32.mrb[1].mxu0  ;;  %v149_v39 = vadd.f32 %v552_v36, %v703_v1 }
  0xe9   :  { %v148_v38 = vadd.f32 %v119_v37, %v698_v0 }
  0xeb   :  { %v555_v40 = vpop.f32.mrb[2].mxu0  ;;  %575 = vmatprep.mubr.msk.f32.mxu1 %vm34_vm0, %v148_v38 }
  0xec   :  { %v129_v41 = vpop.f32.mrb[3].mxu0  ;;  %576 = vmatmul.mubr.msk.f32.vlgmr.msra.gmra.mrb[0].mxu1 %vm34_vm0, %v149_v39  ;;  %v151_v43 = vadd.f32 %v555_v40, %v715_v4 }
  0xed   :  { %v150_v42 = vadd.f32 %v129_v41, %v708_v2  ;;  %661 = vmatpush3.bf16.msra.mxu1 %v641_v33 }
  0xee   :  { %658 = vmatprep.subr.bf16.mxu1 %v645_v35 }
  0xef   :  { %v558_v44 = vpop.f32.mrb[4].mxu0  ;;  %578 = vmatprep.mubr.msk.f32.mxu1 %vm34_vm0, %v150_v42 }
  0xf0   :  { %v139_v45 = vpop.f32.mrb[5].mxu0  ;;  %579 = vmatmul.mubr.msk.f32.gmra.mrb[2].mxu1 %vm34_vm0, %v151_v43  ;;  %v153_v47 = vadd.f32 %v558_v44, %v727_v7 }
  0xf1   :  { %v152_v46 = vadd.f32 %v139_v45, %v722_v6  ;;  %662 = vmatpush3.bf16.msra.mxu1 %v645_v35 }
  0xf2   :  { %659 = vmatprep.subr.bf16.mxu1 %v649_v50 }
  0xf3   :  { %581 = vmatprep.mubr.msk.f32.mxu1 %vm34_vm0, %v152_v46 }
  0xf4   :  { %582 = vmatmul.mubr.msk.f32.gmra.mrb[4].mxu1 %vm34_vm0, %v153_v47 }
  0xf5   :  { %663 = vmatpush3.bf16.msra.mxu1 %v649_v50 }
  0xf6   :  { %660 = vmatprep.subr.bf16.mxu1 %v653_v53 }
  0xf9   :  { %664 = vmatpush3.bf16.msra.mxu1 %v653_v53 }
 0x1bf   :  { %v577_v55 = vpop.f32.mrb[0].mxu1 }
 0x1c0   :  { %v283_v57 = vmul.f32 %v577_v55, %v479_v54  ;;  %v246_v58 = vpop.f32.mrb[1].mxu1 }
 0x1c1   :  { %v282_v59 = vmul.f32 %v479_v54, %v246_v58 }
 0x1c2   :  { %v297_v60 = vadd.f32 %v481_v56, %v283_v57 }
 0x1c3   :  { %v296_v61 = vadd.f32 %v481_v56, %v282_v59  ;;  %v580_v62 = vpop.f32.mrb[2].mxu1 }
 0x1c4   :  { %v285_v63 = vmul.f32 %v580_v62, %v479_v54  ;;  %v256_v0 = vpop.f32.mrb[3].mxu1  ;;  %v303_v3 = vmax.f32 %v297_v60, 0.0 }
 0x1c5   :  { %v302_v1 = vmax.f32 %v296_v61, 0.0  ;;  %v284_v2 = vmul.f32 %v479_v54, %v256_v0 }
 0x1c6   :  { %v299_v4 = vadd.f32 %v481_v56, %v285_v63 }
 0x1c7   :  { %v298_v5 = vadd.f32 %v481_v56, %v284_v2  ;;  %v583_v6 = vpop.f32.mrb[4].mxu1  ;;  %600 = vmatprep.mubr.msk.f32.mxu0 %vm34_vm0, %v302_v1 }
 0x1c8   :  { %v287_v7 = vmul.f32 %v583_v6, %v479_v54  ;;  %v266_v8 = vpop.f32.mrb[5].mxu1  ;;  %601 = vmatmul.mubr.msk.f32.vlgmr.msra.gmra.mrb[6].mxu0 %vm34_vm0, %v303_v3  ;;  %v305_v11 = vmax.f32 %v299_v4, 0.0 }
 0x1c9   :  { %v304_v9 = vmax.f32 %v298_v5, 0.0  ;;  %v286_v10 = vmul.f32 %v479_v54, %v266_v8 }
 0x1ca   :  { %v301_v12 = vadd.f32 %v481_v56, %v287_v7 }
 0x1cb   :  { %v300_v13 = vadd.f32 %v481_v56, %v286_v10  ;;  %603 = vmatprep.mubr.msk.f32.mxu1 %vm34_vm0, %v304_v9 }
 0x1cc   :  { %604 = vmatmul.mubr.msk.f32.vlgmr.msra.gmra.mrb[6].mxu1 %vm34_vm0, %v305_v11  ;;  %v307_v15 = vmax.f32 %v301_v12, 0.0 }
 0x1cd   :  { %v306_v14 = vmax.f32 %v300_v13, 0.0 }
 0x1cf   :  { %606 = vmatprep.mubr.msk.f32.mxu1 %vm34_vm0, %v306_v14 }
 0x1d0   :  { %607 = vmatmul.mubr.msk.f32.gmra.mrb[8].mxu1 %vm34_vm0, %v307_v15 }
 0x29b   :  { %v602_v17 = vpop.f32.mrb[6].mxu0 }
 0x29c   :  { %v438_v19 = vmul.f32 %v602_v17, %v489_v16  ;;  %v400_v20 = vpop.f32.mrb[7].mxu0 }
 0x29d   :  { %v437_v21 = vmul.f32 %v489_v16, %v400_v20 }
 0x29e   :  { %v452_v22 = vadd.f32 %v491_v18, %v438_v19 }
 0x29f   :  { %v451_v23 = vadd.f32 %v491_v18, %v437_v21  ;;  %v605_v24 = vpop.f32.mrb[6].mxu1 }
 0x2a0   :  { %458 = vst.msk [vmem:[%s868_s5 + $0x8] sm:$0xff] %vm34_vm0, %v452_v22  ;;  %v440_v25 = vmul.f32 %v605_v24, %v489_v16  ;;  %v410_v26 = vpop.f32.mrb[7].mxu1 }
 0x2a1   :  { %457 = vst.msk [vmem:[%s868_s5] sm:$0xff] %vm34_vm0, %v451_v23  ;;  %v439_v27 = vmul.f32 %v489_v16, %v410_v26 }
 0x2a2   :  { %v454_v28 = vadd.f32 %v491_v18, %v440_v25 }
 0x2a3   :  { %v453_v29 = vadd.f32 %v491_v18, %v439_v27  ;;  %v608_v30 = vpop.f32.mrb[8].mxu1 }
 0x2a4   :  { %460 = vst.msk [vmem:[%s868_s5 + $0x18] sm:$0xff] %vm34_vm0, %v454_v28  ;;  %v442_v31 = vmul.f32 %v608_v30, %v489_v16  ;;  %v420_v32 = vpop.f32.mrb[9].mxu1 }
 0x2a5   :  { %459 = vst.msk [vmem:[%s868_s5 + $0x10] sm:$0xff] %vm34_vm0, %v453_v29  ;;  %v441_v33 = vmul.f32 %v489_v16, %v420_v32 }
 0x2a6   :  { %v456_v34 = vadd.f32 %v491_v18, %v442_v31 }
 0x2a7   :  { %v455_v35 = vadd.f32 %v491_v18, %v441_v33 }
 0x2a8   :  { %462 = vst.msk [vmem:[%s868_s5 + $0x28] sm:$0xff] %vm34_vm0, %v456_v34 }
 0x2a9   :  { %461 = vst.msk [vmem:[%s868_s5 + $0x20] sm:$0xff] %vm34_vm0, %v455_v35 }

// kernel: gin_link_pred.5
= control target key start
LH: loop header
LB: loop body
LE: loop exit
PB: predicated region body
PF: predicated region fallthrough
CT: control target
= control target key end

     0   :  { %s1476_s0 = inlined_call_operand.vmem [shape: f32[64,768], index: 0, kind: input, shape index: {}]   ;;  %s1477_s1 = inlined_call_operand.vmem [shape: f32[64,768], index: 1, kind: input, shape index: {}]   ;;  %s1478_s2 = inlined_call_operand.vmem [shape: f32[2,64,64], index: 2, kind: input, shape index: {}]   ;;  %s1479_s3 = inlined_call_operand.vmem [shape: f32[3,64,1], index: 3, kind: input, shape index: {}]   ;;  %s1480_s4 = inlined_call_operand.<no memory space> [shape: f32[1,1], index: 4, kind: input, shape index: {}]   ;;  %s1481_s5 = inlined_call_operand.vmem [shape: f32[1,768], index: 5, kind: output, shape index: {}]  }
   0x1   :  { %10 = sst [smem:[#allocation2]] %s1480_s4 }
   0x2   :  { %s1187_s20 = smov 0   ;;  %s1189_s21 = smov 0  }
   0x3   :  { %s1191_s22 = smov 0  }
   0x4 LB: > { %s1008_s4 = sadd.s32 4294967295, %s1149_s22   ;;  %s1204_s23 = sadd.s32 1, %s1149_s22   ;;  %s1149_s22 = sphi %s1191_s22, %s1485_s22   ;;  %s1145_s21 = sphi %s1189_s21, %s1484_s21   ;;  %s1141_s20 = sphi %s1187_s20, %s1483_s20  }
   0x5   : > { %s20_s24 = ssub.s32 %s1149_s22, %s1204_s23  ;;  %s23_s25 = sadd.s32 1, %s1145_s21 }
   0x6   : > { %p21_p0 = scmp.eq.s32.totalorder %s20_s24, 0  ;;  %p30_p1 = scmp.ne.s32.totalorder %s1145_s21, %s1141_s20 }
   0x7   : > { %p31_p2 = scmp.eq.s32.totalorder %s1149_s22, 0  ;;  %p1011_p4 = scmp.ge.s32.totalorder %s1149_s22, 3 }
   0x8   : > { %s1213_s26 = scalar_select %p21_p0, %s1145_s21, %s23_s25  }
   0x9   : > { %p1215_p3 = por %p31_p2, %p30_p1  ;;  %180 = sbr.rel (%p1011_p4) target bundleno = 40 (0x28), region = 28 }
  0x10   : > { %183 = sbr.rel (!%p1215_p3) target bundleno = 28 (0x1c), region = 32  ;;  %s185_s28 = sand.u32 (%p1215_p3), 1, %s1145_s21  }
  0x11   : > { %s1064_s29 = sshll.u32 (%p1215_p3), %s1149_s22, 4  ;;  %s1012_s30 = sshll.u32 (%p1215_p3), %s185_s28, 7 }
  0x12   : > { %s1227_s8 = scalar_lea.vmem (%p1215_p3), %s1476_s0, %s1064_s29  ;;  %s187_s9 = scalar_lea.vmem (%p1215_p3), [#allocation3], %s1012_s30 }
  0x13   : > { %v203_v0 = vld [vmem:[%s1227_s8] sm:$0xff] (%p1215_p3)  ;;  %v205_v1 = vld [vmem:[%s1227_s8 + $0x8] sm:$0xff] (%p1215_p3)  ;;  %v207_v2 = vld [vmem:[%s1227_s8 + $0x30] sm:$0xff] (%p1215_p3) }
  0x14   : > { %204 = vst [vmem:[%s187_s9] sm:$0xff] (%p1215_p3), %v203_v0  ;;  %206 = vst [vmem:[%s187_s9 + $0x8] sm:$0xff] (%p1215_p3), %v205_v1  ;;  %v209_v3 = vld [vmem:[%s1227_s8 + $0x38] sm:$0xff] (%p1215_p3)  ;;  %v211_v4 = vld [vmem:[%s1227_s8 + $0x60] sm:$0xff] (%p1215_p3) }
  0x15   : > { %208 = vst [vmem:[%s187_s9 + $0x10] sm:$0xff] (%p1215_p3), %v207_v2  ;;  %v213_v5 = vld [vmem:[%s1227_s8 + $0x68] sm:$0xff] (%p1215_p3)  ;;  %210 = vst [vmem:[%s187_s9 + $0x18] sm:$0xff] (%p1215_p3), %v209_v3  ;;  %v215_v6 = vld [vmem:[%s1227_s8 + $0x90] sm:$0xff] (%p1215_p3) }
  0x16   : > { %212 = vst [vmem:[%s187_s9 + $0x20] sm:$0xff] (%p1215_p3), %v211_v4  ;;  %214 = vst [vmem:[%s187_s9 + $0x28] sm:$0xff] (%p1215_p3), %v213_v5  ;;  %v217_v7 = vld [vmem:[%s1227_s8 + $0x98] sm:$0xff] (%p1215_p3)  ;;  %v219_v8 = vld [vmem:[%s1227_s8 + $0xc0] sm:$0xff] (%p1215_p3) }
  0x17   : > { %216 = vst [vmem:[%s187_s9 + $0x30] sm:$0xff] %v215_v6  ;;  %218 = vst [vmem:[%s187_s9 + $0x38] sm:$0xff] %v217_v7  ;;  %v221_v9 = vld [vmem:[%s1227_s8 + $0xc8] sm:$0xff]  ;;  %v223_v10 = vld [vmem:[%s1227_s8 + $0xf0] sm:$0xff] }
  0x18   : > { %220 = vst [vmem:[%s187_s9 + $0x40] sm:$0xff] %v219_v8  ;;  %v225_v11 = vld [vmem:[%s1227_s8 + $0xf8] sm:$0xff]  ;;  %222 = vst [vmem:[%s187_s9 + $0x48] sm:$0xff] %v221_v9  ;;  %v227_v12 = vld [vmem:[%s1227_s8 + $0x120] sm:$0xff] }
  0x19   : > { %224 = vst [vmem:[%s187_s9 + $0x50] sm:$0xff] %v223_v10  ;;  %226 = vst [vmem:[%s187_s9 + $0x58] sm:$0xff] %v225_v11  ;;  %v229_v13 = vld [vmem:[%s1227_s8 + $0x128] sm:$0xff]  ;;  %v231_v14 = vld [vmem:[%s1227_s8 + $0x150] sm:$0xff] }
  0x1a   : > { %228 = vst [vmem:[%s187_s9 + $0x60] sm:$0xff] %v227_v12  ;;  %230 = vst [vmem:[%s187_s9 + $0x68] sm:$0xff] %v229_v13  ;;  %v233_v15 = vld [vmem:[%s1227_s8 + $0x158] sm:$0xff] }
  0x1b   : > { %232 = vst [vmem:[%s187_s9 + $0x70] sm:$0xff] %v231_v14  ;;  %234 = vst [vmem:[%s187_s9 + $0x78] sm:$0xff] %v233_v15 }
  0x1c PF: > { %240 = sbr.rel (!%p1215_p3) target bundleno = 40 (0x28), region = 55  ;;  %s242_s10 = sand.u32 (%p1215_p3), 1, %s1145_s21  }
  0x1d   : > { %s1065_s11 = sshll.u32 (%p1215_p3), %s1149_s22, 4  ;;  %s1015_s12 = sshll.u32 (%p1215_p3), %s242_s10, 7 }
  0x1e   : > { %s1252_s15 = scalar_lea.vmem (%p1215_p3), %s1477_s1, %s1065_s11  ;;  %s244_s16 = scalar_lea.vmem (%p1215_p3), [#allocation4], %s1015_s12 }
  0x1f   : > { %v260_v16 = vld [vmem:[%s1252_s15] sm:$0xff] (%p1215_p3)  ;;  %v262_v17 = vld [vmem:[%s1252_s15 + $0x8] sm:$0xff] (%p1215_p3)  ;;  %v264_v18 = vld [vmem:[%s1252_s15 + $0x30] sm:$0xff] (%p1215_p3) }
  0x20   : > { %261 = vst [vmem:[%s244_s16] sm:$0xff] (%p1215_p3), %v260_v16  ;;  %263 = vst [vmem:[%s244_s16 + $0x8] sm:$0xff] (%p1215_p3), %v262_v17  ;;  %v266_v19 = vld [vmem:[%s1252_s15 + $0x38] sm:$0xff] (%p1215_p3)  ;;  %v268_v20 = vld [vmem:[%s1252_s15 + $0x60] sm:$0xff] (%p1215_p3) }
  0x21   : > { %265 = vst [vmem:[%s244_s16 + $0x10] sm:$0xff] (%p1215_p3), %v264_v18  ;;  %v270_v21 = vld [vmem:[%s1252_s15 + $0x68] sm:$0xff] (%p1215_p3)  ;;  %267 = vst [vmem:[%s244_s16 + $0x18] sm:$0xff] (%p1215_p3), %v266_v19  ;;  %v272_v22 = vld [vmem:[%s1252_s15 + $0x90] sm:$0xff] (%p1215_p3) }
  0x22   : > { %269 = vst [vmem:[%s244_s16 + $0x20] sm:$0xff] (%p1215_p3), %v268_v20  ;;  %271 = vst [vmem:[%s244_s16 + $0x28] sm:$0xff] (%p1215_p3), %v270_v21  ;;  %v274_v23 = vld [vmem:[%s1252_s15 + $0x98] sm:$0xff] (%p1215_p3)  ;;  %v276_v24 = vld [vmem:[%s1252_s15 + $0xc0] sm:$0xff] (%p1215_p3) }
  0x23   : > { %273 = vst [vmem:[%s244_s16 + $0x30] sm:$0xff] %v272_v22  ;;  %275 = vst [vmem:[%s244_s16 + $0x38] sm:$0xff] %v274_v23  ;;  %v278_v25 = vld [vmem:[%s1252_s15 + $0xc8] sm:$0xff]  ;;  %v280_v26 = vld [vmem:[%s1252_s15 + $0xf0] sm:$0xff] }
  0x24   : > { %277 = vst [vmem:[%s244_s16 + $0x40] sm:$0xff] %v276_v24  ;;  %v282_v27 = vld [vmem:[%s1252_s15 + $0xf8] sm:$0xff]  ;;  %279 = vst [vmem:[%s244_s16 + $0x48] sm:$0xff] %v278_v25  ;;  %v284_v28 = vld [vmem:[%s1252_s15 + $0x120] sm:$0xff] }
  0x25   : > { %281 = vst [vmem:[%s244_s16 + $0x50] sm:$0xff] %v280_v26  ;;  %283 = vst [vmem:[%s244_s16 + $0x58] sm:$0xff] %v282_v27  ;;  %v286_v29 = vld [vmem:[%s1252_s15 + $0x128] sm:$0xff]  ;;  %v288_v30 = vld [vmem:[%s1252_s15 + $0x150] sm:$0xff] }
  0x26   : > { %285 = vst [vmem:[%s244_s16 + $0x60] sm:$0xff] %v284_v28  ;;  %287 = vst [vmem:[%s244_s16 + $0x68] sm:$0xff] %v286_v29  ;;  %v290_v31 = vld [vmem:[%s1252_s15 + $0x158] sm:$0xff] }
  0x27   : > { %289 = vst [vmem:[%s244_s16 + $0x70] sm:$0xff] %v288_v30  ;;  %291 = vst [vmem:[%s244_s16 + $0x78] sm:$0xff] %v290_v31 }
  0x28 PF: > { %p1018_p5 = scmp.ge.s32.totalorder %s1149_s22, 1  ;;  %p296_p6 = scmp.lt.s32.totalorder %s1149_s22, 4 }
  0x2a   : > { %p297_p7 = pnand %p1018_p5, %p296_p6 }
  0x2b   : > { %s303_s17 = sand.u32 (!%p297_p7), 1, %s1141_s20   ;;  %v1151_v32 = vmov (!%p297_p7), 0.0   ;;  %v1152_v33 = vmov (!%p297_p7), 0   ;;  %v403_v34 = vld [vmem:[%s1479_s3] sm:$0xff] (!%p297_p7)  ;;  %v405_v22 = vld [vmem:[%s1479_s3 + $0x10] sm:$0xff] (!%p297_p7)  ;;  %v404_v26 = vld [vmem:[%s1479_s3 + $0x8] sm:$0xff] (!%p297_p7) }
  0x2c   : > { %300 = sbr.rel (%p297_p7) target bundleno = 589 (0x24d), region = 78  ;;  %s1019_s18 = sshll.u32 (!%p297_p7), %s303_s17, 7  ;;  %540 = vmatprep.mubr.f32.mxu0 (!%p297_p7), %v1151_v32  ;;  %751 = vmatprep.mubr.f32.mxu1 (!%p297_p7), %v1151_v32  ;;  %v406_v28 = vld [vmem:[%s1479_s3 + $0x18] sm:$0xff] (!%p297_p7)  ;;  %v407_v29 = vld [vmem:[%s1479_s3 + $0x20] sm:$0xff] (!%p297_p7)  ;;  %v408_v31 = vld [vmem:[%s1479_s3 + $0x28] sm:$0xff] (!%p297_p7)  ;;  %vm451_vm0 = vcmask (!%p297_p7), 523264  }
  0x2d   : > { %1125 = vset.pattern.permute.xlu0 (!%p297_p7), %v1152_v33  ;;  %1126 = vset.pattern.permute.xlu1 (!%p297_p7), %v1152_v33  ;;  %s1278_s25 = scalar_lea.vmem (!%p297_p7), [#allocation3], %s1019_s18  ;;  %s1282_s20 = scalar_lea.vmem (!%p297_p7), [#allocation4], %s1019_s18  ;;  %v409_v33 = vld [vmem:[%s1479_s3 + $0x30] sm:$0xff] (!%p297_p7) }
  0x2e   : > { %v348_v35 = vld [vmem:[%s1278_s25 + $0x8] sm:$0xff] (!%p297_p7)  ;;  %v350_v36 = vld [vmem:[%s1278_s25 + $0x18] sm:$0xff] (!%p297_p7)  ;;  %413 = vperm.xlu0 (!%p297_p7), %1125, %v403_v34   ;;  %v347_v40 = vld [vmem:[%s1278_s25] sm:$0xff] (!%p297_p7)  ;;  %423 = vperm.xlu1 (!%p297_p7), %1126, %v405_v22   ;;  %s907_s17 = sld [smem:[#allocation2]] (!%p297_p7)  ;;  %s1021_s18 = sshll.u32 (!%p297_p7), %s1008_s4, 1 }
  0x2f   : > { %v364_v37 = vld [vmem:[%s1282_s20 + $0x8] sm:$0xff] (!%p297_p7)  ;;  %v366_v38 = vld [vmem:[%s1282_s20 + $0x18] sm:$0xff] (!%p297_p7)  ;;  %v349_v41 = vld [vmem:[%s1278_s25 + $0x10] sm:$0xff] (!%p297_p7)  ;;  %p343_p8 = scmp.lt.s32.totalorder (!%p297_p7), %s1021_s18, 5 }
  0x30   : > { %v380_v39 = vmul.f32 (!%p297_p7), %v364_v37, %v348_v35  ;;  %v382_v42 = vmul.f32 (!%p297_p7), %v366_v38, %v350_v36  ;;  %v363_v43 = vld [vmem:[%s1282_s20] sm:$0xff] (!%p297_p7)  ;;  %v365_v44 = vld [vmem:[%s1282_s20 + $0x10] sm:$0xff] (!%p297_p7)  ;;  %v352_v45 = vld [vmem:[%s1278_s25 + $0x28] sm:$0xff] (!%p297_p7) }
  0x31   : > { %v379_v46 = vmul.f32 (!%p297_p7), %v363_v43, %v347_v40  ;;  %v381_v47 = vmul.f32 (!%p297_p7), %v365_v44, %v349_v41  ;;  %v354_v48 = vld [vmem:[%s1278_s25 + $0x38] sm:$0xff] (!%p297_p7)  ;;  %v368_v49 = vld [vmem:[%s1282_s20 + $0x28] sm:$0xff] (!%p297_p7)  ;;  %v351_v54 = vld [vmem:[%s1278_s25 + $0x20] sm:$0xff] (!%p297_p7) }
  0x32   : > { %v370_v50 = vld [vmem:[%s1282_s20 + $0x38] sm:$0xff] (!%p297_p7)  ;;  %v1066_v51 = vpack.c.bf16 (!%p297_p7), %v382_v42, %v380_v39  ;;  %v384_v52 = vmul.f32 (!%p297_p7), %v368_v49, %v352_v45  ;;  %v353_v55 = vld [vmem:[%s1278_s25 + $0x30] sm:$0xff] (!%p297_p7)  ;;  %v367_v56 = vld [vmem:[%s1282_s20 + $0x20] sm:$0xff] (!%p297_p7)  ;;  %418 = vperm.xlu0 (!%p297_p7), %1125, %v404_v26   ;;  %428 = vperm.xlu1 (!%p297_p7), %1126, %v406_v28  }
  0x33   : > { %v386_v53 = vmul.f32 %v370_v50, %v354_v48  ;;  %v1068_v57 = vpack.c.bf16 %v381_v47, %v379_v46  ;;  %v369_v58 = vld [vmem:[%s1282_s20 + $0x30] sm:$0xff]  ;;  %v383_v59 = vmul.f32 %v367_v56, %v351_v54  ;;  %v356_v60 = vld [vmem:[%s1278_s25 + $0x48] sm:$0xff]  ;;  %v358_v61 = vld [vmem:[%s1278_s25 + $0x58] sm:$0xff]  ;;  %s1487_s18 = smov (!%p343_p8, %s1021_s18), 5 }
  0x34   : > { %1067 = vmatprep.subr.bf16.mxu0 %v1066_v51  ;;  %v385_v63 = vmul.f32 %v369_v58, %v353_v55  ;;  %v372_v0 = vld [vmem:[%s1282_s20 + $0x48] sm:$0xff]  ;;  %v374_v1 = vld [vmem:[%s1282_s20 + $0x58] sm:$0xff]  ;;  %v355_v2 = vld [vmem:[%s1278_s25 + $0x40] sm:$0xff]  ;;  %s345_s22 = scalar_lea.vmem %s1481_s5, %s1487_s18 }
  0x35   : > { %v1070_v62 = vpack.c.bf16 %v386_v53, %v384_v52  ;;  %1069 = vmatpush1.bf16.msra.mxu0 %v1068_v57  ;;  %v388_v3 = vmul.f32 %v372_v0, %v356_v60  ;;  %v390_v4 = vmul.f32 %v374_v1, %v358_v61  ;;  %v357_v5 = vld [vmem:[%s1278_s25 + $0x50] sm:$0xff]  ;;  %v371_v6 = vld [vmem:[%s1282_s20 + $0x40] sm:$0xff]  ;;  %v360_v11 = vld [vmem:[%s1278_s25 + $0x68] sm:$0xff] }
  0x36   : > { %v373_v7 = vld [vmem:[%s1282_s20 + $0x50] sm:$0xff]  ;;  %v1072_v8 = vpack.c.bf16 %v385_v63, %v383_v59  ;;  %v387_v9 = vmul.f32 %v371_v6, %v355_v2  ;;  %v362_v12 = vld [vmem:[%s1278_s25 + $0x78] sm:$0xff]  ;;  %v376_v13 = vld [vmem:[%s1282_s20 + $0x68] sm:$0xff]  ;;  %433 = vperm.xlu0 %1125, %v407_v29   ;;  %438 = vperm.xlu1 %1126, %v408_v31  }
  0x37   : > { %1071 = vmatprep.subr.bf16.mxu0 %v1070_v62  ;;  %v389_v10 = vmul.f32 %v373_v7, %v357_v5  ;;  %v1074_v14 = vpack.c.bf16 %v390_v4, %v388_v3  ;;  %v378_v15 = vld [vmem:[%s1282_s20 + $0x78] sm:$0xff]  ;;  %v392_v16 = vmul.f32 %v376_v13, %v360_v11  ;;  %v359_v17 = vld [vmem:[%s1278_s25 + $0x60] sm:$0xff]  ;;  %v361_v18 = vld [vmem:[%s1278_s25 + $0x70] sm:$0xff] }
  0x38   : > { %v394_v19 = vmul.f32 %v378_v15, %v362_v12  ;;  %v375_v20 = vld [vmem:[%s1282_s20 + $0x60] sm:$0xff]  ;;  %v377_v21 = vld [vmem:[%s1282_s20 + $0x70] sm:$0xff]  ;;  %v410_v35 = vld [vmem:[%s1479_s3 + $0x38] sm:$0xff] }
  0x39   : > { %1073 = vmatpush1.bf16.msra.mxu0 %v1072_v8  ;;  %v1076_v23 = vpack.c.bf16 %v389_v10, %v387_v9  ;;  %v391_v24 = vmul.f32 %v375_v20, %v359_v17  ;;  %v393_v25 = vmul.f32 %v377_v21, %v361_v18  ;;  %v395_v34 = vld [vmem:[%s1478_s2] sm:$0xff]  ;;  %v396_v37 = vld [vmem:[%s1478_s2 + $0x8] sm:$0xff]  ;;  %v1040_v39 = vld [vmem:[%s1479_s3 + $0x50] sm:$0xff] }
  0x3a   : > { %1075 = vmatprep.subr.bf16.mxu0 %v1074_v14  ;;  %v1078_v27 = vpack.c.bf16 %v394_v19, %v392_v16  ;;  %443 = vperm.xlu0 %1125, %v409_v33   ;;  %v1038_v36 = vld [vmem:[%s1479_s3 + $0x40] sm:$0xff]  ;;  %v1039_v38 = vld [vmem:[%s1479_s3 + $0x48] sm:$0xff]  ;;  %v397_v40 = vld [vmem:[%s1478_s2 + $0x10] sm:$0xff] }
  0x3b   : > { %v1080_v30 = vpack.c.bf16 %v393_v25, %v391_v24  ;;  %448 = vperm.xlu1 %1126, %v410_v35   ;;  %v1041_v41 = vld [vmem:[%s1479_s3 + $0x58] sm:$0xff]  ;;  %v1054_v42 = vld [vmem:[%s1479_s3 + $0x80] sm:$0xff]  ;;  %v1055_v44 = vld [vmem:[%s1479_s3 + $0x88] sm:$0xff] }
  0x3c   : > { %v398_v43 = vld [vmem:[%s1478_s2 + $0x18] sm:$0xff]  ;;  %v1042_v45 = vld [vmem:[%s1479_s3 + $0x60] sm:$0xff]  ;;  %v1056_v47 = vld [vmem:[%s1479_s3 + $0x90] sm:$0xff] }
  0x3d   : > { %1077 = vmatpush1.bf16.msra.mxu0 %v1076_v23  ;;  %v399_v46 = vld [vmem:[%s1478_s2 + $0x20] sm:$0xff]  ;;  %v1043_v48 = vld [vmem:[%s1479_s3 + $0x68] sm:$0xff]  ;;  %v1057_v50 = vld [vmem:[%s1479_s3 + $0x98] sm:$0xff] }
  0x3e   : > { %1079 = vmatprep.subr.bf16.mxu0 %v1078_v27  ;;  %625 = vperm.xlu0 %1125, %v1038_v36   ;;  %v400_v49 = vld [vmem:[%s1478_s2 + $0x28] sm:$0xff]  ;;  %v1044_v51 = vld [vmem:[%s1479_s3 + $0x70] sm:$0xff]  ;;  %v1058_v53 = vld [vmem:[%s1479_s3 + $0xa0] sm:$0xff] }
  0x3f   : > { %630 = vperm.xlu1 %1126, %v1039_v38   ;;  %v401_v52 = vld [vmem:[%s1478_s2 + $0x30] sm:$0xff]  ;;  %v1045_v54 = vld [vmem:[%s1479_s3 + $0x78] sm:$0xff]  ;;  %v1059_v56 = vld [vmem:[%s1479_s3 + $0xa8] sm:$0xff] }
  0x40   : > { %v402_v55 = vld [vmem:[%s1478_s2 + $0x38] sm:$0xff]  ;;  %v1060_v57 = vld [vmem:[%s1479_s3 + $0xb0] sm:$0xff] }
  0x41   : > { %1081 = vmatpush1.bf16.msra.mxu0 %v1080_v30  ;;  %v1061_v58 = vld [vmem:[%s1479_s3 + $0xb8] sm:$0xff] }
  0x42   : > { %635 = vperm.xlu0 %1125, %v1040_v39  }
  0x43   : > { %640 = vperm.xlu1 %1126, %v1041_v41  }
  0x44   : > { %1022 = vmatmul.mubr.msk.f32.vlgmr.msra.gmra.mrb[0].mxu0 %vm451_vm0, %v395_v34 }
  0x45   : > { %546 = vmatprep.mubr.f32.mxu0 %v1151_v32 }
  0x46   : > { %827 = vperm.xlu0 %1125, %v1054_v42  }
  0x47   : > { %832 = vperm.xlu1 %1126, %v1055_v44  }
  0x48   : > { %1023 = vmatmul.mubr.msk.f32.gmra.mrb[2].mxu0 %vm451_vm0, %v396_v37 }
  0x49   : > { %552 = vmatprep.mubr.f32.mxu0 %v1151_v32 }
  0x4a   : > { %645 = vperm.xlu0 %1125, %v1042_v45  }
  0x4b   : > { %837 = vperm.xlu1 %1126, %v1056_v47  }
  0x4c   : > { %1024 = vmatmul.mubr.msk.f32.gmra.mrb[4].mxu0 %vm451_vm0, %v397_v40 }
  0x4d   : > { %558 = vmatprep.mubr.f32.mxu0 %v1151_v32 }
  0x4e   : > { %650 = vperm.xlu0 %1125, %v1043_v48  }
  0x4f   : > { %842 = vperm.xlu1 %1126, %v1057_v50  }
  0x50   : > { %1025 = vmatmul.mubr.msk.f32.gmra.mrb[6].mxu0 %vm451_vm0, %v398_v43 }
  0x51   : > { %564 = vmatprep.mubr.f32.mxu0 %v1151_v32 }
  0x52   : > { %655 = vperm.xlu0 %1125, %v1044_v51  }
  0x53   : > { %847 = vperm.xlu1 %1126, %v1058_v53  }
  0x54   : > { %1026 = vmatmul.mubr.msk.f32.gmra.mrb[8].mxu0 %vm451_vm0, %v399_v46 }
  0x55   : > { %570 = vmatprep.mubr.f32.mxu0 %v1151_v32 }
  0x56   : > { %660 = vperm.xlu0 %1125, %v1045_v54  }
  0x57   : > { %852 = vperm.xlu1 %1126, %v1059_v56  }
  0x58   : > { %1027 = vmatmul.mubr.msk.f32.gmra.mrb[10].mxu0 %vm451_vm0, %v400_v49 }
  0x59   : > { %576 = vmatprep.mubr.f32.mxu0 %v1151_v32 }
  0x5a   : > { %857 = vperm.xlu0 %1125, %v1060_v57  }
  0x5b   : > { %862 = vperm.xlu1 %1126, %v1061_v58  }
  0x5c   : > { %1028 = vmatmul.mubr.msk.f32.gmra.mrb[12].mxu0 %vm451_vm0, %v401_v52 }
  0x5d   : > { %582 = vmatprep.mubr.f32.mxu0 %v1151_v32 }
  0x60   : > { %1029 = vmatmul.mubr.msk.f32.gmra.mrb[14].mxu0 %vm451_vm0, %v402_v55 }
  0xad   : > { %v414_v59 = vpop.permute.xlu0 %413  ;;  %v424_v4 = vpop.permute.xlu1 %423 }
  0xb1   : > { %v419_v63 = vpop.permute.xlu0 %418  ;;  %v429_v15 = vpop.permute.xlu1 %428 }
  0xb5   : > { %v434_v28 = vpop.permute.xlu0 %433  ;;  %v439_v31 = vpop.permute.xlu1 %438 }
  0xb9   : > { %v444_v45 = vpop.permute.xlu0 %443 }
  0xba   : > { %v449_v48 = vpop.permute.xlu1 %448 }
 0x117   : > { %v542_v60 = vpop.f32.mrb[0].mxu0 }
 0x118   : > { %v544_v61 = vpop.f32.mrb[1].mxu0  ;;  %v543_v62 = vadd.f32 %v542_v60, %v414_v59  ;;  %v1030_v60 = vld [vmem:[%s1478_s2 + $0x40] sm:$0xff] }
 0x119   : > { %v545_v0 = vadd.f32 %v544_v61, %v414_v59  ;;  %v1031_v61 = vld [vmem:[%s1478_s2 + $0x48] sm:$0xff] }
 0x11a   : > { %v589_v6 = vmax.f32 %v543_v62, 0.0  ;;  %v1032_v62 = vld [vmem:[%s1478_s2 + $0x50] sm:$0xff] }
 0x11b   : > { %v548_v1 = vpop.f32.mrb[2].mxu0  ;;  %v590_v8 = vmax.f32 %v545_v0, 0.0  ;;  %v1034_v0 = vld [vmem:[%s1478_s2 + $0x60] sm:$0xff] }
 0x11c   : > { %v549_v2 = vadd.f32 %v548_v1, %v419_v63  ;;  %v550_v3 = vpop.f32.mrb[3].mxu0  ;;  %v1035_v1 = vld [vmem:[%s1478_s2 + $0x68] sm:$0xff] }
 0x11d   : > { %v551_v5 = vadd.f32 %v550_v3, %v419_v63  ;;  %v1033_v63 = vld [vmem:[%s1478_s2 + $0x58] sm:$0xff] }
 0x11e   : > { %v591_v7 = vmax.f32 %v549_v2, 0.0  ;;  %v1036_v2 = vld [vmem:[%s1478_s2 + $0x70] sm:$0xff]  ;;  %v1037_v3 = vld [vmem:[%s1478_s2 + $0x78] sm:$0xff] }
 0x11f   : > { %v592_v9 = vmax.f32 %v551_v5, 0.0  ;;  %v554_v10 = vpop.f32.mrb[4].mxu0  ;;  %v631_v5 = vpop.permute.xlu1 %630 }
 0x120   : > { %v556_v11 = vpop.f32.mrb[5].mxu0  ;;  %v1084_v12 = vpack.c.bf16 %v591_v7, %v589_v6  ;;  %v555_v14 = vadd.f32 %v554_v10, %v424_v4 }
 0x121   : > { %v1082_v13 = vpack.c.bf16 %v592_v9, %v590_v8  ;;  %v557_v16 = vadd.f32 %v556_v11, %v424_v4  ;;  %v626_v4 = vpop.permute.xlu0 %625 }
 0x122   : > { %v593_v21 = vmax.f32 %v555_v14, 0.0 }
 0x123   : > { %v560_v17 = vpop.f32.mrb[6].mxu0  ;;  %1083 = vmatprep.subr.bf16.mxu1 %v1082_v13  ;;  %v594_v23 = vmax.f32 %v557_v16, 0.0  ;;  %v641_v7 = vpop.permute.xlu1 %640 }
 0x124   : > { %v561_v18 = vadd.f32 %v560_v17, %v429_v15  ;;  %v562_v19 = vpop.f32.mrb[7].mxu0  ;;  %1085 = vmatpush1.bf16.msra.mxu1 %v1084_v12 }
 0x125   : > { %v563_v20 = vadd.f32 %v562_v19, %v429_v15  ;;  %v636_v6 = vpop.permute.xlu0 %635 }
 0x126   : > { %v595_v22 = vmax.f32 %v561_v18, 0.0 }
 0x127   : > { %v596_v24 = vmax.f32 %v563_v20, 0.0  ;;  %v566_v25 = vpop.f32.mrb[8].mxu0  ;;  %v833_v9 = vpop.permute.xlu1 %832 }
 0x128   : > { %v1088_v26 = vpack.c.bf16 %v595_v22, %v593_v21  ;;  %v568_v27 = vpop.f32.mrb[9].mxu0  ;;  %v567_v30 = vadd.f32 %v566_v25, %v434_v28 }
 0x129   : > { %v1086_v29 = vpack.c.bf16 %v596_v24, %v594_v23  ;;  %v569_v33 = vadd.f32 %v568_v27, %v434_v28  ;;  %v828_v8 = vpop.permute.xlu0 %827 }
 0x12a   : > { %v597_v38 = vmax.f32 %v567_v30, 0.0 }
 0x12b   : > { %v572_v34 = vpop.f32.mrb[10].mxu0  ;;  %1087 = vmatprep.subr.bf16.mxu1 %v1086_v29  ;;  %v598_v40 = vmax.f32 %v569_v33, 0.0  ;;  %v838_v18 = vpop.permute.xlu1 %837 }
 0x12c   : > { %v573_v35 = vadd.f32 %v572_v34, %v439_v31  ;;  %v574_v36 = vpop.f32.mrb[11].mxu0  ;;  %1089 = vmatpush1.bf16.msra.mxu1 %v1088_v26 }
 0x12d   : > { %v575_v37 = vadd.f32 %v574_v36, %v439_v31  ;;  %v646_v14 = vpop.permute.xlu0 %645 }
 0x12e   : > { %v599_v39 = vmax.f32 %v573_v35, 0.0 }
 0x12f   : > { %v600_v41 = vmax.f32 %v575_v37, 0.0  ;;  %v578_v42 = vpop.f32.mrb[12].mxu0  ;;  %v843_v35 = vpop.permute.xlu1 %842 }
 0x130   : > { %v1092_v43 = vpack.c.bf16 %v599_v39, %v597_v38  ;;  %v580_v44 = vpop.f32.mrb[13].mxu0  ;;  %v579_v47 = vadd.f32 %v578_v42, %v444_v45 }
 0x131   : > { %v1090_v46 = vpack.c.bf16 %v600_v41, %v598_v40  ;;  %v581_v49 = vadd.f32 %v580_v44, %v444_v45  ;;  %v651_v28 = vpop.permute.xlu0 %650 }
 0x132   : > { %v601_v54 = vmax.f32 %v579_v47, 0.0 }
 0x133   : > { %v584_v50 = vpop.f32.mrb[14].mxu0  ;;  %1091 = vmatprep.subr.bf16.mxu1 %v1090_v46  ;;  %v602_v56 = vmax.f32 %v581_v49, 0.0 }
 0x134   : > { %v585_v51 = vadd.f32 %v584_v50, %v449_v48  ;;  %v586_v52 = vpop.f32.mrb[15].mxu0  ;;  %1093 = vmatpush1.bf16.msra.mxu1 %v1092_v43 }
 0x135   : > { %v587_v53 = vadd.f32 %v586_v52, %v449_v48  ;;  %v656_v46 = vpop.permute.xlu0 %655 }
 0x136   : > { %v603_v55 = vmax.f32 %v585_v51, 0.0 }
 0x137   : > { %v604_v57 = vmax.f32 %v587_v53, 0.0  ;;  %v848_v53 = vpop.permute.xlu1 %847 }
 0x138   : > { %v1096_v58 = vpack.c.bf16 %v603_v55, %v601_v54 }
 0x139   : > { %v1094_v59 = vpack.c.bf16 %v604_v57, %v602_v56 }
 0x13b   : > { %1095 = vmatprep.subr.bf16.mxu1 %v1094_v59 }
 0x13c   : > { %1097 = vmatpush1.bf16.msra.mxu1 %v1096_v58 }
 0x13f   : > { %1046 = vmatmul.mubr.msk.f32.vlgmr.msra.gmra.mrb[0].mxu1 %vm451_vm0, %v1030_v60 }
 0x140   : > { %757 = vmatprep.mubr.f32.mxu1 %v1151_v32 }
 0x143   : > { %1047 = vmatmul.mubr.msk.f32.gmra.mrb[2].mxu1 %vm451_vm0, %v1031_v61 }
 0x144   : > { %763 = vmatprep.mubr.f32.mxu1 %v1151_v32 }
 0x147   : > { %1048 = vmatmul.mubr.msk.f32.gmra.mrb[4].mxu1 %vm451_vm0, %v1032_v62 }
 0x148   : > { %769 = vmatprep.mubr.f32.mxu1 %v1151_v32 }
 0x14b   : > { %1049 = vmatmul.mubr.msk.f32.gmra.mrb[6].mxu1 %vm451_vm0, %v1033_v63 }
 0x14c   : > { %775 = vmatprep.mubr.f32.mxu1 %v1151_v32 }
 0x14f   : > { %1050 = vmatmul.mubr.msk.f32.gmra.mrb[8].mxu1 %vm451_vm0, %v1034_v0  ;;  %v661_v0 = vpop.permute.xlu0 %660 }
 0x150   : > { %781 = vmatprep.mubr.f32.mxu1 %v1151_v32 }
 0x153   : > { %1051 = vmatmul.mubr.msk.f32.gmra.mrb[10].mxu1 %vm451_vm0, %v1035_v1 }
 0x154   : > { %787 = vmatprep.mubr.f32.mxu1 %v1151_v32 }
 0x157   : > { %1052 = vmatmul.mubr.msk.f32.gmra.mrb[12].mxu1 %vm451_vm0, %v1036_v2 }
 0x158   : > { %793 = vmatprep.mubr.f32.mxu1 %v1151_v32 }
 0x15b   : > { %1053 = vmatmul.mubr.msk.f32.gmra.mrb[14].mxu1 %vm451_vm0, %v1037_v3 }
 0x212   : > { %v753_v10 = vpop.f32.mrb[0].mxu1 }
 0x213   : > { %v754_v11 = vadd.f32 %v753_v10, %v626_v4  ;;  %v755_v12 = vpop.f32.mrb[1].mxu1 }
 0x214   : > { %v756_v13 = vadd.f32 %v755_v12, %v626_v4 }
 0x215   : > { %v800_v16 = vmax.f32 %v754_v11, 0.0 }
 0x216   : > { %v759_v15 = vpop.f32.mrb[2].mxu1  ;;  %v801_v19 = vmax.f32 %v756_v13, 0.0 }
 0x217   : > { %v760_v32 = vadd.f32 %v759_v15, %v631_v5  ;;  %v761_v17 = vpop.f32.mrb[3].mxu1  ;;  %v865_v24 = vmul.f32 %v828_v8, %v800_v16  ;;  %v858_v16 = vpop.permute.xlu0 %857 }
 0x218   : > { %v762_v20 = vadd.f32 %v761_v17, %v631_v5  ;;  %v866_v29 = vmul.f32 %v828_v8, %v801_v19  ;;  %v853_v5 = vpop.permute.xlu1 %852 }
 0x219   : > { %v802_v21 = vmax.f32 %v760_v32, 0.0 }
 0x21a   : > { %v803_v22 = vmax.f32 %v762_v20, 0.0  ;;  %v765_v23 = vpop.f32.mrb[4].mxu1 }
 0x21b   : > { %v867_v25 = vmul.f32 %v833_v9, %v802_v21  ;;  %v766_v26 = vadd.f32 %v765_v23, %v636_v6  ;;  %v767_v27 = vpop.f32.mrb[5].mxu1 }
 0x21c   : > { %v868_v30 = vmul.f32 %v833_v9, %v803_v22  ;;  %v768_v31 = vadd.f32 %v767_v27, %v636_v6 }
 0x21d   : > { %v881_v33 = vadd.f32 %v867_v25, %v865_v24  ;;  %v804_v34 = vmax.f32 %v766_v26, 0.0  ;;  %v863_v26 = vpop.permute.xlu1 %862 }
 0x21e   : > { %v894_v36 = vadd.f32 %v868_v30, %v866_v29  ;;  %v805_v37 = vmax.f32 %v768_v31, 0.0  ;;  %v771_v38 = vpop.f32.mrb[6].mxu1 }
 0x21f   : > { %v869_v39 = vmul.f32 %v838_v18, %v804_v34  ;;  %v772_v40 = vadd.f32 %v771_v38, %v641_v7  ;;  %v773_v41 = vpop.f32.mrb[7].mxu1 }
 0x220   : > { %v870_v42 = vmul.f32 %v838_v18, %v805_v37  ;;  %v774_v43 = vadd.f32 %v773_v41, %v641_v7 }
 0x221   : > { %v882_v44 = vadd.f32 %v881_v33, %v869_v39  ;;  %v806_v45 = vmax.f32 %v772_v40, 0.0  ;;  %v1153_v40 = vmov 1966171168  }
 0x222   : > { %v895_v47 = vadd.f32 %v894_v36, %v870_v42  ;;  %v807_v48 = vmax.f32 %v774_v43, 0.0  ;;  %v777_v49 = vpop.f32.mrb[8].mxu1  ;;  %v915_v41 = vunpack.c.l.s4 %v1153_v40  ;;  %v917_v42 = vlaneseq }
 0x223   : > { %v871_v50 = vmul.f32 %v843_v35, %v806_v45  ;;  %v778_v51 = vadd.f32 %v777_v49, %v646_v14  ;;  %v779_v52 = vpop.f32.mrb[9].mxu1 }
 0x224   : > { %v872_v54 = vmul.f32 %v843_v35, %v807_v48  ;;  %v780_v55 = vadd.f32 %v779_v52, %v646_v14  ;;  %v916_v48 = vunpack.c.0.s8 %v915_v41  ;;  %v918_v49 = vshrl.u32 %v917_v42, 7 }
 0x225   : > { %v883_v56 = vadd.f32 %v882_v44, %v871_v50  ;;  %v808_v57 = vmax.f32 %v778_v51, 0.0  ;;  %vm931_vm1 = vcmp.lt.s32.totalorder %v917_v42, 256 }
 0x226   : > { %v896_v58 = vadd.f32 %v895_v47, %v872_v54  ;;  %v809_v59 = vmax.f32 %v780_v55, 0.0  ;;  %v783_v60 = vpop.f32.mrb[10].mxu1  ;;  %v919_v54 = vsub.s32 %v916_v48, %v918_v49 }
 0x227   : > { %v873_v61 = vmul.f32 %v848_v53, %v808_v57  ;;  %v784_v62 = vadd.f32 %v783_v60, %v651_v28  ;;  %v785_v63 = vpop.f32.mrb[11].mxu1 }
 0x228   : > { %v874_v1 = vmul.f32 %v848_v53, %v809_v59  ;;  %v786_v2 = vadd.f32 %v785_v63, %v651_v28 }
 0x229   : > { %v884_v3 = vadd.f32 %v883_v56, %v873_v61  ;;  %v810_v4 = vmax.f32 %v784_v62, 0.0 }
 0x22a   : > { %v897_v6 = vadd.f32 %v896_v58, %v874_v1  ;;  %v811_v7 = vmax.f32 %v786_v2, 0.0  ;;  %v789_v8 = vpop.f32.mrb[12].mxu1 }
 0x22b   : > { %v875_v9 = vmul.f32 %v853_v5, %v810_v4  ;;  %v790_v10 = vadd.f32 %v789_v8, %v656_v46  ;;  %v791_v11 = vpop.f32.mrb[13].mxu1 }
 0x22c   : > { %v876_v12 = vmul.f32 %v853_v5, %v811_v7  ;;  %v792_v13 = vadd.f32 %v791_v11, %v656_v46  ;;  %v908_v46 = vstv %s907_s17 }
 0x22d   : > { %v885_v14 = vadd.f32 %v884_v3, %v875_v9  ;;  %v812_v15 = vmax.f32 %v790_v10, 0.0 }
 0x22e   : > { %v898_v32 = vadd.f32 %v897_v6, %v876_v12  ;;  %v813_v17 = vmax.f32 %v792_v13, 0.0  ;;  %v795_v18 = vpop.f32.mrb[14].mxu1 }
 0x22f   : > { %v877_v19 = vmul.f32 %v858_v16, %v812_v15  ;;  %v796_v20 = vadd.f32 %v795_v18, %v661_v0  ;;  %v797_v21 = vpop.f32.mrb[15].mxu1 }
 0x230   : > { %v878_v22 = vmul.f32 %v858_v16, %v813_v17  ;;  %v798_v23 = vadd.f32 %v797_v21, %v661_v0 }
 0x231   : > { %v886_v24 = vadd.f32 %v885_v14, %v877_v19  ;;  %v814_v25 = vmax.f32 %v796_v20, 0.0 }
 0x232   : > { %v899_v27 = vadd.f32 %v898_v32, %v878_v22  ;;  %v815_v28 = vmax.f32 %v798_v23, 0.0 }
 0x233   : > { %v879_v29 = vmul.f32 %v863_v26, %v814_v25 }
 0x234   : > { %v880_v30 = vmul.f32 %v863_v26, %v815_v28 }
 0x235   : > { %v887_v31 = vadd.f32 %v886_v24, %v879_v29 }
 0x236   : > { %v900_v33 = vadd.f32 %v899_v27, %v880_v30 }
 0x237   : > { %v888_v34 = vrot.slane %v887_v31, 4 }
 0x238   : > { %v901_v35 = vrot.slane %v900_v33, 4 }
 0x239   : > { %v889_v36 = vadd.f32 %v888_v34, %v887_v31 }
 0x23a   : > { %v902_v37 = vadd.f32 %v901_v35, %v900_v33 }
 0x23b   : > { %v890_v38 = vrot.slane %v889_v36, 2 }
 0x23c   : > { %v903_v39 = vrot.slane %v902_v37, 2 }
 0x23d   : > { %v891_v43 = vadd.f32 %v890_v38, %v889_v36 }
 0x23e   : > { %v904_v44 = vadd.f32 %v903_v39, %v902_v37 }
 0x23f   : > { %v892_v45 = vrot.slane %v891_v43, 1 }
 0x240   : > { %v905_v47 = vrot.slane %v904_v44, 1 }
 0x241   : > { %v893_v50 = vadd.f32 %v892_v45, %v891_v43 }
 0x242   : > { %v906_v51 = vadd.f32 %v905_v47, %v904_v44 }
 0x243   : > { %v909_v52 = vadd.f32 %v908_v46, %v893_v50 }
 0x244   : > { %v910_v53 = vadd.f32 %v908_v46, %v906_v51 }
 0x246   : > { %v913_v55 = vcombine.low %v909_v52, %v910_v53 }
 0x248   : > { %v920_v56 = vrot.slane %v913_v55, %v919_v54 }
 0x24a   : > { %v927_v57 = vrot.slane %v920_v56, %v919_v54 }
 0x24c   : > { %933 = vst.msk [vmem:[%s345_s22] sm:$0x3] %vm931_vm1, %v927_v57 }
 0x24d PF: > { %p13_p9 = scmp.ge.s32.totalorder %s1204_s23, 5   ;;  %s1483_s20 = smov %s1145_s21 }
 0x24e   : > { %s1484_s21 = smov %s1213_s26  ;;  %s1485_s22 = smov %s1204_s23 }
 0x24f   :  { %15 = sbr.rel (!%p13_p9) target bundleno = 4 (0x4), region = 132 }

</bundles_post_ra>
